<compile_context>
chip_gen: v6e
topology: v6e:2x2x1
jax: 0.10.0
libtpu: 0.0.40
codegen_flags: <defaults>
</compile_context>

<pallas_src>
import functools

import jax
import jax.numpy as jnp
from jax.experimental import pallas as pl
from jax.experimental.pallas import tpu as pltpu

NUM_LAYERS = 6
H = 128  # width of first/last hidden layer; all middle layers fit in 128 lanes


def _round_up(x, m):
    return (x + m - 1) // m * m


def _choose_tb(B, max_tb=512):
    """Batch-tile size: multiple of 8, minimal padding (usually B_pad == round_up(B,8)),
    and an even grid length so v7x's two TensorCores stay balanced."""
    B8 = _round_up(max(B, 8), 8)
    half = B8 // 2
    if 16 <= B8 <= 2 * max_tb and half % 8 == 0:
        return half                          # grid = (2,), zero extra padding
    if B8 <= max_tb:
        return B8                             # grid = (1,)
    n = 2
    while True:                               # even number of tiles, each <= max_tb
        tb = _round_up((B8 + n - 1) // n, 8)
        if tb <= max_tb:
            return tb
        n += 2


# --------------------------------------------------------------------------
# Kernel: one batch tile through the whole encoder + decoder.
#   x_ref    : [TB, P]        bf16  activation tile (batch-tiled over the grid)
#   w0_ref   : [P, 128]       bf16  layer-0 weight (resident)
#   wmid_ref : [4, 128, 128]  bf16  layers 1-4, zero-padded (resident)
#   w5_ref   : [128, P]       bf16  layer-5 weight (resident)
#   b_ref    : [8, P]         f32   biases, rows 0..5 used (resident)
#   out_ref  : [TB, P]        bf16
# --------------------------------------------------------------------------
def autoencoder_kernel(x_ref, w0_ref, wmid_ref, w5_ref, b_ref, out_ref):
    b_all = b_ref[...]                                            # [8, P] f32

    # Layer 0: [TB, P] @ [P, 128] -> [TB, 128]
    acc = jnp.dot(x_ref[...], w0_ref[...],
                  preferred_element_type=jnp.float32) + b_all[0:1, :H]
    h = jnp.maximum(acc, 0.0).astype(jnp.bfloat16)

    # Layers 1..4: [TB, 128] @ [128, 128] (zero-padded beyond the real fan-in/out)
    for i in range(4):
        acc = jnp.dot(h, wmid_ref[i],
                      preferred_element_type=jnp.float32) + b_all[i + 1:i + 2, :H]
        h = jnp.maximum(acc, 0.0).astype(jnp.bfloat16)

    # Layer 5: [TB, 128] @ [128, P] + sigmoid (exp + approx reciprocal -> EUP)
    acc = jnp.dot(h, w5_ref[...],
                  preferred_element_type=jnp.float32) + b_all[5:6, :]
    sig = pl.reciprocal(1.0 + jnp.exp(-acc), approx=True)
    out_ref[...] = sig.astype(out_ref.dtype)


# --------------------------------------------------------------------------
# Parameter packing: two widths (P for outer layers, 128 for middle layers).
# --------------------------------------------------------------------------
def pack_params(params, input_size):
    P = _round_up(max(input_size, H), 128)

    w0 = jnp.zeros((P, H), jnp.float32).at[:input_size, :H].set(params[0][0])
    wmid = jnp.zeros((4, H, H), jnp.float32)
    for i in range(1, 5):
        w, _ = params[i]
        fi, fo = w.shape
        wmid = wmid.at[i - 1, :fi, :fo].set(w)
    w5 = jnp.zeros((H, P), jnp.float32).at[:H, :input_size].set(params[5][0])

    b = jnp.zeros((8, P), jnp.float32)                  # 6 rows used, pad to 8
    for i, (_, bi) in enumerate(params):
        b = b.at[i, :bi.shape[-1]].set(bi.reshape(-1))

    return (w0.astype(jnp.bfloat16), wmid.astype(jnp.bfloat16),
            w5.astype(jnp.bfloat16), b, P)


# --------------------------------------------------------------------------
# Wrapper: batch-tiled pallas_call with resident weights/biases.
# --------------------------------------------------------------------------
@functools.partial(jax.jit, static_argnames=("input_size",))
def autoencoder_forward(x, w0, wmid, w5, b, *, input_size):
    B = x.shape[0]
    P = w0.shape[0]
    tb = _choose_tb(B)
    B_pad = _round_up(max(B, 8), tb)

    # bf16 activations: the cast fuses with the pad; when no padding is needed
    # it is a pure dtype cast (no extra HBM pass).
    if B_pad == B and input_size == P:
        xp = x.astype(jnp.bfloat16)
    else:
        xp = jnp.zeros((B_pad, P), jnp.bfloat16).at[:B, :input_size].set(
            x.astype(jnp.bfloat16))

    grid = (B_pad // tb,)

    macs_per_row = 2 * P * H + 4 * H * H
    flops = 2 * B_pad * macs_per_row
    bytes_accessed = (2 * B_pad * P * 2                 # bf16 x in + out
                      + (2 * P * H + 4 * H * H) * 2     # bf16 weights
                      + 8 * P * 4)                      # f32 biases

    out = pl.pallas_call(
        autoencoder_kernel,
        out_shape=jax.ShapeDtypeStruct((B_pad, P), jnp.bfloat16),
        grid=grid,
        in_specs=[
            pl.BlockSpec((tb, P), lambda i: (i, 0)),          # x: batch-tiled
            pl.BlockSpec((P, H), lambda i: (0, 0)),           # w0 resident
            pl.BlockSpec((4, H, H), lambda i: (0, 0, 0)),     # w1..w4 resident
            pl.BlockSpec((H, P), lambda i: (0, 0)),           # w5 resident
            pl.BlockSpec((8, P), lambda i: (0, 0)),           # biases resident
        ],
        out_specs=pl.BlockSpec((tb, P), lambda i: (i, 0)),
        compiler_params=pltpu.CompilerParams(
            dimension_semantics=("parallel",),                # megacore on v7x
            vmem_limit_bytes=32 * 1024 * 1024,                # usage ~2 MiB, safe everywhere
        ),
        cost_estimate=pl.CostEstimate(
            flops=flops,
            transcendentals=2 * B_pad * P,                    # exp + reciprocal
            bytes_accessed=bytes_accessed,
        ),
    )(xp, w0, wmid, w5, b)

    return out[:B, :input_size].astype(jnp.float32)


# --------------------------------------------------------------------------
# Init + references
# --------------------------------------------------------------------------
def init_params(key, input_size):
    """nn.Linear-style init U(-1/sqrt(fan_in), 1/sqrt(fan_in)); weights stored
    as [in_features, out_features] (already transposed vs torch)."""
    dims = [(input_size, 128), (128, 64), (64, 32),
            (32, 64), (64, 128), (128, input_size)]
    params = []
    for fan_in, fan_out in dims:
        key, kw, kb = jax.random.split(key, 3)
        bound = 1.0 / jnp.sqrt(jnp.float32(fan_in))
        w = jax.random.uniform(kw, (fan_in, fan_out), jnp.float32, -bound, bound)
        bi = jax.random.uniform(kb, (1, fan_out), jnp.float32, -bound, bound)
        params.append((w, bi))
    return params


def reference_forward_f32(x, params):
    h = x
    for i, (w, bi) in enumerate(params):
        h = h @ w + bi
        h = jnp.maximum(h, 0.0) if i < NUM_LAYERS - 1 else jax.nn.sigmoid(h)
    return h


def reference_forward_mixed(x, params):
    """Same bf16 cast points as the kernel (f32 accumulation, f32 sigmoid)."""
    h = x
    for i, (w, bi) in enumerate(params):
        h = jnp.dot(h.astype(jnp.bfloat16), w.astype(jnp.bfloat16),
                    preferred_element_type=jnp.float32) + bi
        h = jnp.maximum(h, 0.0) if i < NUM_LAYERS - 1 else jax.nn.sigmoid(h)
    return h


if __name__ == "__main__":
    key = jax.random.PRNGKey(0)
    input_size = 256
    batch = 384          # -> tb=192, grid=(2,): zero pad rows, even grid for v7x

    kx, kp = jax.random.split(key)
    x = jax.random.uniform(kx, (batch, input_size), jnp.float32)
    params = init_params(kp, input_size)

    w0, wmid, w5, b_packed, _ = pack_params(params, input_size)
    out = autoencoder_forward(x, w0, wmid, w5, b_packed, input_size=input_size)
    out = jax.block_until_ready(out)

    assert out.shape == (batch, input_size)

    ref_mixed = reference_forward_mixed(x, params)
    ref_f32 = reference_forward_f32(x, params)
    # Tolerances account for bf16 output quantization + approx EUP reciprocal.
    assert jnp.allclose(out, ref_mixed, atol=1e-2, rtol=1e-2), \
        "mismatch vs mixed-precision reference"
    assert jnp.allclose(out, ref_f32, atol=5e-2, rtol=5e-2), \
        "mismatch vs f32 reference"

    print("KERNEL_OK")
</pallas_src>

<mosaic_0001>
module attributes {stable_mosaic.version = 11 : i64} {
  func.func @autoencoder_kernel(%arg0: i32, %arg1: memref<192x256xbf16, #tpu.memory_space<vmem>>, %arg2: memref<256x128xbf16, #tpu.memory_space<vmem>>, %arg3: memref<4x128x128xbf16, #tpu.memory_space<vmem>>, %arg4: memref<128x256xbf16, #tpu.memory_space<vmem>>, %arg5: memref<8x256xf32, #tpu.memory_space<vmem>>, %arg6: memref<192x256xbf16, #tpu.memory_space<vmem>>) attributes {dimension_semantics = [#tpu.dimension_semantics<parallel>], iteration_bounds = array<i64: 2>, scalar_prefetch = 0 : i64, scratch_operands = 0 : i64, tpu.core_type = #tpu.core_type<tc>, window_params = [{transform_indices = @transform_0, window_bounds = array<i64: 192, 256>}, {pipeline_mode = #tpu.pipeline_mode<synchronous>, transform_indices = @transform_1, window_bounds = array<i64: 256, 128>}, {pipeline_mode = #tpu.pipeline_mode<synchronous>, transform_indices = @transform_2, window_bounds = array<i64: 4, 128, 128>}, {pipeline_mode = #tpu.pipeline_mode<synchronous>, transform_indices = @transform_3, window_bounds = array<i64: 128, 256>}, {pipeline_mode = #tpu.pipeline_mode<synchronous>, transform_indices = @transform_4, window_bounds = array<i64: 8, 256>}, {transform_indices = @transform_5, window_bounds = array<i64: 192, 256>}]} {
    %c0 = arith.constant 0 : index
    %c0_0 = arith.constant 0 : index
    %0 = vector.load %arg5[%c0, %c0_0] : memref<8x256xf32, #tpu.memory_space<vmem>>, vector<8x256xf32>
    %c0_1 = arith.constant 0 : index
    %c0_2 = arith.constant 0 : index
    %1 = vector.load %arg1[%c0_1, %c0_2] : memref<192x256xbf16, #tpu.memory_space<vmem>>, vector<192x256xbf16>
    %c0_3 = arith.constant 0 : index
    %c0_4 = arith.constant 0 : index
    %2 = vector.load %arg2[%c0_3, %c0_4] : memref<256x128xbf16, #tpu.memory_space<vmem>>, vector<256x128xbf16>
    %cst = arith.constant dense<0.000000e+00> : vector<192x128xf32>
    %3 = tpu.matmul %1, %2, %cst {dimension_numbers = #tpu.dot_dimension_numbers<[1], [0], [0], [1], [0, 0, 1, 1], [], []>} : vector<192x256xbf16>, vector<256x128xbf16>, vector<192x128xf32> -> vector<192x128xf32>
    %4 = vector.extract_strided_slice %0 {offsets = [0, 0], sizes = [1, 128], strides = [1, 1]} : vector<8x256xf32> to vector<1x128xf32>
    %5 = vector.broadcast %4 : vector<1x128xf32> to vector<192x128xf32>
    %6 = arith.addf %3, %5 : vector<192x128xf32>
    %cst_5 = arith.constant 0.000000e+00 : f32
    %7 = vector.broadcast %cst_5 : f32 to vector<192x128xf32>
    %8 = arith.maximumf %6, %7 : vector<192x128xf32>
    %9 = arith.truncf %8 : vector<192x128xf32> to vector<192x128xbf16>
    %c0_6 = arith.constant 0 : index
    %c0_7 = arith.constant 0 : index
    %c0_8 = arith.constant 0 : index
    %10 = vector.load %arg3[%c0_6, %c0_7, %c0_8] : memref<4x128x128xbf16, #tpu.memory_space<vmem>>, vector<1x128x128xbf16>
    %11 = vector.shape_cast %10 : vector<1x128x128xbf16> to vector<128x128xbf16>
    %cst_9 = arith.constant dense<0.000000e+00> : vector<192x128xf32>
    %12 = tpu.matmul %9, %11, %cst_9 {dimension_numbers = #tpu.dot_dimension_numbers<[1], [0], [0], [1], [0, 0, 1, 1], [], []>} : vector<192x128xbf16>, vector<128x128xbf16>, vector<192x128xf32> -> vector<192x128xf32>
    %13 = vector.extract_strided_slice %0 {offsets = [1, 0], sizes = [1, 128], strides = [1, 1]} : vector<8x256xf32> to vector<1x128xf32>
    %14 = vector.broadcast %13 : vector<1x128xf32> to vector<192x128xf32>
    %15 = arith.addf %12, %14 : vector<192x128xf32>
    %cst_10 = arith.constant 0.000000e+00 : f32
    %16 = vector.broadcast %cst_10 : f32 to vector<192x128xf32>
    %17 = arith.maximumf %15, %16 : vector<192x128xf32>
    %18 = arith.truncf %17 : vector<192x128xf32> to vector<192x128xbf16>
    %c1 = arith.constant 1 : index
    %c0_11 = arith.constant 0 : index
    %c0_12 = arith.constant 0 : index
    %19 = vector.load %arg3[%c1, %c0_11, %c0_12] : memref<4x128x128xbf16, #tpu.memory_space<vmem>>, vector<1x128x128xbf16>
    %20 = vector.shape_cast %19 : vector<1x128x128xbf16> to vector<128x128xbf16>
    %cst_13 = arith.constant dense<0.000000e+00> : vector<192x128xf32>
    %21 = tpu.matmul %18, %20, %cst_13 {dimension_numbers = #tpu.dot_dimension_numbers<[1], [0], [0], [1], [0, 0, 1, 1], [], []>} : vector<192x128xbf16>, vector<128x128xbf16>, vector<192x128xf32> -> vector<192x128xf32>
    %22 = vector.extract_strided_slice %0 {offsets = [2, 0], sizes = [1, 128], strides = [1, 1]} : vector<8x256xf32> to vector<1x128xf32>
    %23 = vector.broadcast %22 : vector<1x128xf32> to vector<192x128xf32>
    %24 = arith.addf %21, %23 : vector<192x128xf32>
    %cst_14 = arith.constant 0.000000e+00 : f32
    %25 = vector.broadcast %cst_14 : f32 to vector<192x128xf32>
    %26 = arith.maximumf %24, %25 : vector<192x128xf32>
    %27 = arith.truncf %26 : vector<192x128xf32> to vector<192x128xbf16>
    %c2 = arith.constant 2 : index
    %c0_15 = arith.constant 0 : index
    %c0_16 = arith.constant 0 : index
    %28 = vector.load %arg3[%c2, %c0_15, %c0_16] : memref<4x128x128xbf16, #tpu.memory_space<vmem>>, vector<1x128x128xbf16>
    %29 = vector.shape_cast %28 : vector<1x128x128xbf16> to vector<128x128xbf16>
    %cst_17 = arith.constant dense<0.000000e+00> : vector<192x128xf32>
    %30 = tpu.matmul %27, %29, %cst_17 {dimension_numbers = #tpu.dot_dimension_numbers<[1], [0], [0], [1], [0, 0, 1, 1], [], []>} : vector<192x128xbf16>, vector<128x128xbf16>, vector<192x128xf32> -> vector<192x128xf32>
    %31 = vector.extract_strided_slice %0 {offsets = [3, 0], sizes = [1, 128], strides = [1, 1]} : vector<8x256xf32> to vector<1x128xf32>
    %32 = vector.broadcast %31 : vector<1x128xf32> to vector<192x128xf32>
    %33 = arith.addf %30, %32 : vector<192x128xf32>
    %cst_18 = arith.constant 0.000000e+00 : f32
    %34 = vector.broadcast %cst_18 : f32 to vector<192x128xf32>
    %35 = arith.maximumf %33, %34 : vector<192x128xf32>
    %36 = arith.truncf %35 : vector<192x128xf32> to vector<192x128xbf16>
    %c3 = arith.constant 3 : index
    %c0_19 = arith.constant 0 : index
    %c0_20 = arith.constant 0 : index
    %37 = vector.load %arg3[%c3, %c0_19, %c0_20] : memref<4x128x128xbf16, #tpu.memory_space<vmem>>, vector<1x128x128xbf16>
    %38 = vector.shape_cast %37 : vector<1x128x128xbf16> to vector<128x128xbf16>
    %cst_21 = arith.constant dense<0.000000e+00> : vector<192x128xf32>
    %39 = tpu.matmul %36, %38, %cst_21 {dimension_numbers = #tpu.dot_dimension_numbers<[1], [0], [0], [1], [0, 0, 1, 1], [], []>} : vector<192x128xbf16>, vector<128x128xbf16>, vector<192x128xf32> -> vector<192x128xf32>
    %40 = vector.extract_strided_slice %0 {offsets = [4, 0], sizes = [1, 128], strides = [1, 1]} : vector<8x256xf32> to vector<1x128xf32>
    %41 = vector.broadcast %40 : vector<1x128xf32> to vector<192x128xf32>
    %42 = arith.addf %39, %41 : vector<192x128xf32>
    %cst_22 = arith.constant 0.000000e+00 : f32
    %43 = vector.broadcast %cst_22 : f32 to vector<192x128xf32>
    %44 = arith.maximumf %42, %43 : vector<192x128xf32>
    %45 = arith.truncf %44 : vector<192x128xf32> to vector<192x128xbf16>
    %c0_23 = arith.constant 0 : index
    %c0_24 = arith.constant 0 : index
    %46 = vector.load %arg4[%c0_23, %c0_24] : memref<128x256xbf16, #tpu.memory_space<vmem>>, vector<128x256xbf16>
    %cst_25 = arith.constant dense<0.000000e+00> : vector<192x256xf32>
    %47 = tpu.matmul %45, %46, %cst_25 {dimension_numbers = #tpu.dot_dimension_numbers<[1], [0], [0], [1], [0, 0, 1, 1], [], []>} : vector<192x128xbf16>, vector<128x256xbf16>, vector<192x256xf32> -> vector<192x256xf32>
    %48 = vector.extract_strided_slice %0 {offsets = [5, 0], sizes = [1, 256], strides = [1, 1]} : vector<8x256xf32> to vector<1x256xf32>
    %49 = vector.broadcast %48 : vector<1x256xf32> to vector<192x256xf32>
    %50 = arith.addf %47, %49 : vector<192x256xf32>
    %cst_26 = arith.constant 0.000000e+00 : f32
    %51 = vector.broadcast %cst_26 : f32 to vector<192x256xf32>
    %52 = arith.subf %51, %50 : vector<192x256xf32>
    %53 = math.exp %52 : vector<192x256xf32>
    %cst_27 = arith.constant 1.000000e+00 : f32
    %54 = vector.broadcast %cst_27 : f32 to vector<192x256xf32>
    %55 = arith.addf %54, %53 : vector<192x256xf32>
    %56 = tpu.reciprocal %55 {approx = true} : vector<192x256xf32> -> vector<192x256xf32>
    %57 = arith.truncf %56 : vector<192x256xf32> to vector<192x256xbf16>
    %c0_28 = arith.constant 0 : index
    %c0_29 = arith.constant 0 : index
    %58 = vector.load %arg6[%c0_28, %c0_29] : memref<192x256xbf16, #tpu.memory_space<vmem>>, vector<192x256xbf16>
    tpu.vector_store %arg6[%c0_28, %c0_29], %57 {strides = array<i32>} : memref<192x256xbf16, #tpu.memory_space<vmem>>, vector<192x256xbf16>,
    return
  }
  func.func @transform_0(%arg0: i32) -> (i32, i32) {
    %c0_i32 = arith.constant 0 : i32
    %c0_i32_0 = arith.constant 0 : i32
    return %arg0, %c0_i32 : i32, i32
  }
  func.func @transform_1(%arg0: i32) -> (i32, i32) {
    %c0_i32 = arith.constant 0 : i32
    %c0_i32_0 = arith.constant 0 : i32
    %c0_i32_1 = arith.constant 0 : i32
    return %c0_i32, %c0_i32_0 : i32, i32
  }
  func.func @transform_2(%arg0: i32) -> (i32, i32, i32) {
    %c0_i32 = arith.constant 0 : i32
    %c0_i32_0 = arith.constant 0 : i32
    %c0_i32_1 = arith.constant 0 : i32
    %c0_i32_2 = arith.constant 0 : i32
    return %c0_i32, %c0_i32_0, %c0_i32_1 : i32, i32, i32
  }
  func.func @transform_3(%arg0: i32) -> (i32, i32) {
    %c0_i32 = arith.constant 0 : i32
    %c0_i32_0 = arith.constant 0 : i32
    %c0_i32_1 = arith.constant 0 : i32
    return %c0_i32, %c0_i32_0 : i32, i32
  }
  func.func @transform_4(%arg0: i32) -> (i32, i32) {
    %c0_i32 = arith.constant 0 : i32
    %c0_i32_0 = arith.constant 0 : i32
    %c0_i32_1 = arith.constant 0 : i32
    return %c0_i32, %c0_i32_0 : i32, i32
  }
  func.func @transform_5(%arg0: i32) -> (i32, i32) {
    %c0_i32 = arith.constant 0 : i32
    %c0_i32_0 = arith.constant 0 : i32
    return %arg0, %c0_i32 : i32, i32
  }
}

</mosaic_0001>

<bundles_post_ra>
// kernel: autoencoder_forward.1
= control target key start
LH: loop header
LB: loop body
LE: loop exit
PB: predicated region body
PF: predicated region fallthrough
CT: control target
= control target key end

     0   :  { %s3225_s18 = smov 0   ;;  %s3762_s0 = inlined_call_operand.vmem [shape: bf16[384,256], index: 0, kind: input, shape index: {}]   ;;  %s3763_s1 = inlined_call_operand.vmem [shape: bf16[256,128], index: 1, kind: input, shape index: {}]   ;;  %s3764_s2 = inlined_call_operand.vmem [shape: bf16[4,128,128], index: 2, kind: input, shape index: {}]   ;;  %s3765_s3 = inlined_call_operand.vmem [shape: bf16[128,256], index: 3, kind: input, shape index: {}]   ;;  %s3766_s4 = inlined_call_operand.vmem [shape: f32[8,256], index: 4, kind: input, shape index: {}]   ;;  %s3767_s5 = inlined_call_operand.vmem [shape: bf16[384,256], index: 5, kind: output, shape index: {}]  }
   0x1 LB: > { %s2335_s19 = sadd.s32 4294967295, %s3192_s18   ;;  %p2339_p0 = scmp.ge.s32.totalorder %s3192_s18, 1  ;;  %s3192_s18 = sphi %s3225_s18, %s15_s18  }
   0x2   : > { %p189_p1 = scmp.lt.s32.totalorder %s3192_s18, 3 }
   0x4   : > { %p190_p2 = pnand %p2339_p0, %p189_p1 }
   0x5   : > { %s219_s22 = smul.u32 (!%p190_p2), 24, %s2335_s19 }
   0x6   : > { %193 = sbr.rel (%p190_p2) target bundleno = 1409 (0x581), region = 40 }
   0x7   : > { %p220_p3 = scmp.lt.s32.totalorder (!%p190_p2), %s219_s22, 47 }
   0xb   : > { %v2885_v0 = vld [vmem:[%s3763_s1 + $0x78] sm:$0xff]   ;;  %v2887_v2 = vld [vmem:[%s3763_s1 + $0x70] sm:$0xff]   ;;  %v2889_v4 = vld [vmem:[%s3763_s1 + $0x68] sm:$0xff]   ;;  %s3769_s22 = smov (!%p220_p3, %s219_s22), 47  ;;  %v292_v49 = vlaneseq }
   0xc   : > { %v2886_v1 = vld [vmem:[%s3763_s1 + $0x38] sm:$0xff]   ;;  %2532 = vmatprep.subr.bf16.mxu0 %v2885_v0  ;;  %2860 = vmatprep.subr.bf16.mxu1 %v2885_v0  ;;  %v2888_v3 = vld [vmem:[%s3763_s1 + $0x30] sm:$0xff]   ;;  %v2890_v5 = vld [vmem:[%s3763_s1 + $0x28] sm:$0xff]   ;;  %s2506_s12 = sshll.u32 %s3769_s22, 3 }
   0xd   : > { %2533 = vmatpush3.bf16.msra.mxu0 %v2886_v1  ;;  %2868 = vmatpush3.bf16.msra.mxu1 %v2886_v1  ;;  %v2891_v6 = vld [vmem:[%s3763_s1 + $0x60] sm:$0xff]   ;;  %v2893_v8 = vld [vmem:[%s3763_s1 + $0x58] sm:$0xff]   ;;  %s3268_s17 = scalar_lea.vmem %s3762_s0, %s2506_s12  ;;  %v2895_v10 = vld [vmem:[%s3763_s1 + $0x50] sm:$0xff]   ;;  %v3342_v50 = vshrl.u32 %v292_v49, 7 }
   0xe   : > { %2534 = vmatprep.subr.bf16.mxu0 %v2887_v2  ;;  %2861 = vmatprep.subr.bf16.mxu1 %v2887_v2  ;;  %v2892_v7 = vld [vmem:[%s3763_s1 + $0x20] sm:$0xff]   ;;  %v2894_v9 = vld [vmem:[%s3763_s1 + $0x18] sm:$0xff]   ;;  %v2896_v12 = vld [vmem:[%s3763_s1 + $0x10] sm:$0xff]  }
   0xf   : > { %v2903_v11 = vld [vmem:[%s3268_s17 + $0x4] ss:$8 sps:$4 sm:$0xff]   ;;  %v2901_v18 = vld [vmem:[%s3268_s17] ss:$8 sps:$4 sm:$0xff]   ;;  %v2904_v19 = vld [vmem:[%s3268_s17 + $0x14] ss:$8 sps:$4 sm:$0xff]  }
  0x10   : > { %544 = vmatprep.mubr.bf16.mxu0 %v2903_v11  ;;  %v2897_v13 = vld [vmem:[%s3763_s1 + $0x48] sm:$0xff]   ;;  %v2899_v16 = vld [vmem:[%s3763_s1 + $0x40] sm:$0xff]   ;;  %v2918_v21 = vld [vmem:[%s3268_s17 + $0x74] ss:$8 sps:$4 sm:$0xff]   ;;  %v294_v51 = vsub.s32 0, %v3342_v50 }
  0x11   : > { %2535 = vmatpush3.bf16.msra.mxu0 %v2888_v3  ;;  %2869 = vmatpush3.bf16.msra.mxu1 %v2888_v3  ;;  %v2914_v14 = vld [vmem:[%s3268_s17 + $0x64] ss:$8 sps:$4 sm:$0xff]   ;;  %v2912_v20 = vld [vmem:[%s3268_s17 + $0x60] ss:$8 sps:$4 sm:$0xff]   ;;  %v2937_v22 = vld [vmem:[%s3764_s2 + $0x38] sm:$0xff]  }
  0x12   : > { %2536 = vmatprep.subr.bf16.mxu0 %v2889_v4  ;;  %2862 = vmatprep.subr.bf16.mxu1 %v2889_v4  ;;  %v2898_v15 = vld [vmem:[%s3763_s1 + $0x8] sm:$0xff]   ;;  %v2900_v17 = vld [vmem:[%s3763_s1] sm:$0xff]   ;;  %v2938_v23 = vld [vmem:[%s3764_s2 + $0x30] sm:$0xff]  }
  0x13   : > { %592 = vmatprep.mubr.bf16.mxu1 %v2914_v14  ;;  %v2906_v24 = vld [vmem:[%s3268_s17 + $0x10] ss:$8 sps:$4 sm:$0xff]   ;;  %v2939_v25 = vld [vmem:[%s3764_s2 + $0x28] sm:$0xff]   ;;  %v2940_v29 = vld [vmem:[%s3764_s2 + $0x20] sm:$0xff]  }
  0x14   : > { %v2907_v26 = vld [vmem:[%s3268_s17 + $0x24] ss:$8 sps:$4 sm:$0xff]   ;;  %v2921_v27 = vld [vmem:[%s3268_s17 + $0x70] ss:$8 sps:$4 sm:$0xff]   ;;  %v2909_v31 = vld [vmem:[%s3268_s17 + $0x20] ss:$8 sps:$4 sm:$0xff]  }
  0x15   : > { %2537 = vmatpush3.bf16.msra.mxu0 %v2890_v5  ;;  %2870 = vmatpush3.bf16.msra.mxu1 %v2890_v5  ;;  %v2924_v28 = vld [vmem:[%s3268_s17 + $0x84] ss:$8 sps:$4 sm:$0xff]   ;;  %v2941_v30 = vld [vmem:[%s3764_s2 + $0x18] sm:$0xff]   ;;  %v2927_v33 = vld [vmem:[%s3268_s17 + $0x80] ss:$8 sps:$4 sm:$0xff]  }
  0x16   : > { %2538 = vmatprep.subr.bf16.mxu0 %v2891_v6  ;;  %2863 = vmatprep.subr.bf16.mxu1 %v2891_v6  ;;  %v2910_v32 = vld [vmem:[%s3268_s17 + $0x34] ss:$8 sps:$4 sm:$0xff]   ;;  %v2915_v35 = vld [vmem:[%s3268_s17 + $0x30] ss:$8 sps:$4 sm:$0xff]   ;;  %v2916_v36 = vld [vmem:[%s3268_s17 + $0x44] ss:$8 sps:$4 sm:$0xff]  }
  0x17   : > { %v2928_v34 = vld [vmem:[%s3268_s17 + $0x94] ss:$8 sps:$4 sm:$0xff]   ;;  %v2930_v37 = vld [vmem:[%s3268_s17 + $0x90] ss:$8 sps:$4 sm:$0xff]   ;;  %v2931_v38 = vld [vmem:[%s3268_s17 + $0xa4] ss:$8 sps:$4 sm:$0xff]  }
  0x18   : > { %v2920_v39 = vld [vmem:[%s3268_s17 + $0x40] ss:$8 sps:$4 sm:$0xff]   ;;  %v2922_v40 = vld [vmem:[%s3268_s17 + $0x54] ss:$8 sps:$4 sm:$0xff]   ;;  %v2926_v43 = vld [vmem:[%s3268_s17 + $0x50] ss:$8 sps:$4 sm:$0xff]  }
  0x19   : > { %2539 = vmatpush3.bf16.msra.mxu0 %v2892_v7  ;;  %2871 = vmatpush3.bf16.msra.mxu1 %v2892_v7  ;;  %v2933_v41 = vld [vmem:[%s3268_s17 + $0xa0] ss:$8 sps:$4 sm:$0xff]   ;;  %v2934_v42 = vld [vmem:[%s3268_s17 + $0xb4] ss:$8 sps:$4 sm:$0xff]   ;;  %v2936_v44 = vld [vmem:[%s3268_s17 + $0xb0] ss:$8 sps:$4 sm:$0xff]   ;;  %s3704_s17 = scalar_lea.vmem %s3767_s5, %s2506_s12 }
  0x1a   : > { %2540 = vmatprep.subr.bf16.mxu0 %v2893_v8  ;;  %2864 = vmatprep.subr.bf16.mxu1 %v2893_v8  ;;  %v2942_v45 = vld [vmem:[%s3764_s2 + $0x10] sm:$0xff]   ;;  %v2943_v46 = vld [vmem:[%s3764_s2 + $0x8] sm:$0xff]   ;;  %v2944_v47 = vld [vmem:[%s3764_s2] sm:$0xff]  }
  0x1b   : > { %v2945_v48 = vld [vmem:[%s3764_s2 + $0x78] sm:$0xff]   ;;  %v3348_v53 = vld [vmem:[%s3766_s4] sm:$0xff] }
  0x1c   : > { %v3353_v56 = vrot.slane %v3348_v53, %v294_v51 }
  0x1d   : > { %2541 = vmatpush3.bf16.msra.mxu0 %v2894_v9  ;;  %2872 = vmatpush3.bf16.msra.mxu1 %v2894_v9 }
  0x1e   : > { %2542 = vmatprep.subr.bf16.mxu0 %v2895_v10  ;;  %2865 = vmatprep.subr.bf16.mxu1 %v2895_v10 }
  0x21   : > { %2543 = vmatpush3.bf16.msra.mxu0 %v2896_v12  ;;  %2873 = vmatpush3.bf16.msra.mxu1 %v2896_v12 }
  0x22   : > { %2544 = vmatprep.subr.bf16.mxu0 %v2897_v13  ;;  %2866 = vmatprep.subr.bf16.mxu1 %v2897_v13 }
  0x25   : > { %2545 = vmatpush3.bf16.msra.mxu0 %v2898_v15  ;;  %2874 = vmatpush3.bf16.msra.mxu1 %v2898_v15 }
  0x26   : > { %2546 = vmatprep.subr.bf16.mxu0 %v2899_v16  ;;  %2867 = vmatprep.subr.bf16.mxu1 %v2899_v16 }
  0x29   : > { %2547 = vmatpush3.bf16.msra.mxu0 %v2900_v17  ;;  %2875 = vmatpush3.bf16.msra.mxu1 %v2900_v17 }
  0x2a   : > { %2700 = vmatprep.subr.bf16.mxu1 %v2937_v22 }
  0x2c   : > { %545 = vmatmul.mubr.bf16.vlgmr.msra.gmra.mxu0 %v2901_v18  ;;  %593 = vmatmul.mubr.bf16.vlgmr.msra.gmra.mxu1 %v2912_v20 }
  0x2d   : > { %552 = vmatprep.mubr.bf16.mxu0 %v2904_v19  ;;  %600 = vmatprep.mubr.bf16.mxu1 %v2918_v21 }
  0x2e   : > { %2701 = vmatpush3.bf16.msra.mxu1 %v2937_v22 }
  0x2f   : > { %2702 = vmatprep.subr.bf16.mxu1 %v2938_v23 }
  0x32   : > { %2703 = vmatpush3.bf16.msra.mxu1 %v2938_v23 }
  0x33   : > { %2704 = vmatprep.subr.bf16.mxu1 %v2939_v25 }
  0x34   : > { %553 = vmatmul.mubr.bf16.gmra.mxu0 %v2906_v24  ;;  %601 = vmatmul.mubr.bf16.gmra.mxu1 %v2921_v27  ;;  %v2946_v27 = vld [vmem:[%s3764_s2 + $0x70] sm:$0xff]  }
  0x35   : > { %560 = vmatprep.mubr.bf16.mxu0 %v2907_v26  ;;  %608 = vmatprep.mubr.bf16.mxu1 %v2924_v28 }
  0x36   : > { %2705 = vmatpush3.bf16.msra.mxu1 %v2939_v25 }
  0x37   : > { %2706 = vmatprep.subr.bf16.mxu1 %v2940_v29 }
  0x3a   : > { %2707 = vmatpush3.bf16.msra.mxu1 %v2940_v29 }
  0x3b   : > { %2708 = vmatprep.subr.bf16.mxu1 %v2941_v30 }
  0x3c   : > { %561 = vmatmul.mubr.bf16.gmra.mxu0 %v2909_v31  ;;  %609 = vmatmul.mubr.bf16.gmra.mxu1 %v2927_v33 }
  0x3d   : > { %568 = vmatprep.mubr.bf16.mxu0 %v2910_v32  ;;  %616 = vmatprep.mubr.bf16.mxu1 %v2928_v34 }
  0x3e   : > { %2709 = vmatpush3.bf16.msra.mxu1 %v2941_v30 }
  0x3f   : > { %2710 = vmatprep.subr.bf16.mxu1 %v2942_v45 }
  0x42   : > { %2711 = vmatpush3.bf16.msra.mxu1 %v2942_v45 }
  0x43   : > { %2712 = vmatprep.subr.bf16.mxu1 %v2943_v46 }
  0x44   : > { %569 = vmatmul.mubr.bf16.gmra.mxu0 %v2915_v35  ;;  %617 = vmatmul.mubr.bf16.gmra.mxu1 %v2930_v37  ;;  %v2947_v35 = vld [vmem:[%s3764_s2 + $0x68] sm:$0xff]  }
  0x45   : > { %576 = vmatprep.mubr.bf16.mxu0 %v2916_v36  ;;  %624 = vmatprep.mubr.bf16.mxu1 %v2931_v38 }
  0x46   : > { %2713 = vmatpush3.bf16.msra.mxu1 %v2943_v46 }
  0x47   : > { %2714 = vmatprep.subr.bf16.mxu1 %v2944_v47 }
  0x4a   : > { %2715 = vmatpush3.bf16.msra.mxu1 %v2944_v47 }
  0x4b   : > { %2740 = vmatprep.subr.bf16.mxu1 %v2945_v48 }
  0x4c   : > { %577 = vmatmul.mubr.bf16.gmra.mxu0 %v2920_v39  ;;  %625 = vmatmul.mubr.bf16.gmra.mxu1 %v2933_v41 }
  0x4d   : > { %584 = vmatprep.mubr.bf16.mxu0 %v2922_v40  ;;  %632 = vmatprep.mubr.bf16.mxu1 %v2934_v42 }
  0x54   : > { %585 = vmatmul.mubr.bf16.gmra.mxu0 %v2926_v43  ;;  %633 = vmatmul.mubr.bf16.gmra.mxu1 %v2936_v44  ;;  %v2948_v44 = vld [vmem:[%s3764_s2 + $0x60] sm:$0xff]  }
  0xec   : > { %v2548_v52 = vpop.f32.mrf.mxu0  ;;  %v3350_v54 = vpop.f32.mrf.mxu1 }
  0xee   : > { %v2549_v55 = vpop.f32.mrf.mxu0  ;;  %v3355_v58 = vpop.f32.mrf.mxu1 }
  0xef   : > { %v2550_v57 = vadd.f32 %v2549_v55, %v2548_v52  ;;  %v2949_v55 = vld [vmem:[%s3764_s2 + $0x58] sm:$0xff]  }
  0xf0   : > { %v2551_v59 = vpop.f32.mrf.mxu0  ;;  %v3357_v60 = vpop.f32.mrf.mxu1 }
  0xf1   : > { %v547_v62 = vadd.f32 %v2550_v57, %v3353_v56 }
  0xf2   : > { %v2552_v61 = vpop.f32.mrf.mxu0  ;;  %v3360_v0 = vpop.f32.mrf.mxu1 }
  0xf3   : > { %v2553_v63 = vadd.f32 %v2552_v61, %v2551_v59  ;;  %v641_v5 = vmax.f32 %v547_v62, 0.0 }
  0xf4   : > { %v2554_v1 = vpop.f32.mrf.mxu0  ;;  %v3363_v3 = vpop.f32.mrf.mxu1 }
  0xf5   : > { %v550_v2 = vadd.f32 %v2553_v63, %v3353_v56 }
  0xf6   : > { %v2555_v4 = vpop.f32.mrf.mxu0  ;;  %v3365_v8 = vpop.f32.mrf.mxu1 }
  0xf7   : > { %v642_v6 = vmax.f32 %v550_v2, 0.0  ;;  %v2556_v7 = vadd.f32 %v2555_v4, %v2554_v1  ;;  %v2950_v4 = vld [vmem:[%s3764_s2 + $0x50] sm:$0xff]  }
  0xf8   : > { %v2557_v9 = vpop.f32.mrf.mxu0  ;;  %v3367_v11 = vpop.f32.mrf.mxu1 }
  0xf9   : > { %v665_v10 = vpack.c.bf16 %v642_v6, %v641_v5  ;;  %v555_v13 = vadd.f32 %v2556_v7, %v3353_v56 }
  0xfa   : > { %v2558_v12 = vpop.f32.mrf.mxu0  ;;  %v3370_v15 = vpop.f32.mrf.mxu1 }
  0xfb   : > { %v2559_v14 = vadd.f32 %v2558_v12, %v2557_v9  ;;  %2716 = vmatprep.mubr.bf16.mxu1 %v665_v10  ;;  %v643_v20 = vmax.f32 %v555_v13, 0.0  ;;  %v2586_v9 = vadd.f32 %v3355_v58, %v3350_v54  ;;  %v2589_v10 = vadd.f32 %v3360_v0, %v3357_v60 }
  0xfc   : > { %v2560_v16 = vpop.f32.mrf.mxu0  ;;  %v3373_v18 = vpop.f32.mrf.mxu1  ;;  %v2592_v60 = vadd.f32 %v3365_v8, %v3363_v3  ;;  %v2595_v0 = vadd.f32 %v3370_v15, %v3367_v11 }
  0xfd   : > { %v558_v17 = vadd.f32 %v2559_v14, %v3353_v56 }
  0xfe   : > { %v2561_v19 = vpop.f32.mrf.mxu0  ;;  %v3375_v23 = vpop.f32.mrf.mxu1  ;;  %v603_v3 = vadd.f32 %v2592_v60, %v3353_v56  ;;  %v606_v8 = vadd.f32 %v2595_v0, %v3353_v56 }
  0xff   : > { %v644_v21 = vmax.f32 %v558_v17, 0.0  ;;  %v2562_v22 = vadd.f32 %v2561_v19, %v2560_v16 }
 0x100   : > { %v2563_v24 = vpop.f32.mrf.mxu0  ;;  %v3377_v26 = vpop.f32.mrf.mxu1 }
 0x101   : > { %v666_v25 = vpack.c.bf16 %v644_v21, %v643_v20  ;;  %v563_v29 = vadd.f32 %v2562_v22, %v3353_v56  ;;  %v595_v21 = vadd.f32 %v2586_v9, %v3353_v56  ;;  %v598_v22 = vadd.f32 %v2589_v10, %v3353_v56 }
 0x102   : > { %v2564_v28 = vpop.f32.mrf.mxu0  ;;  %v3383_v31 = vpop.f32.mrf.mxu1 }
 0x103   : > { %v2565_v30 = vadd.f32 %v2564_v28, %v2563_v24  ;;  %2717 = vmatmul.mubr.bf16.vlgmr.msra.gmra.mxu1 %v666_v25  ;;  %v645_v37 = vmax.f32 %v563_v29, 0.0  ;;  %v653_v29 = vmax.f32 %v595_v21, 0.0  ;;  %v695_v21 = vsub.s32 1, %v3342_v50 }
 0x104   : > { %v2566_v32 = vpop.f32.mrf.mxu0  ;;  %2741 = vmatpush3.bf16.msra.mxu1 %v2945_v48  ;;  %v3386_v34 = vpop.f32.mrf.mxu1 }
 0x105   : > { %v566_v33 = vadd.f32 %v2565_v30, %v3353_v56  ;;  %2742 = vmatprep.subr.bf16.mxu1 %v2946_v27  ;;  %v654_v30 = vmax.f32 %v598_v22, 0.0 }
 0x106   : > { %v2567_v36 = vpop.f32.mrf.mxu0  ;;  %v3391_v40 = vpop.f32.mrf.mxu1 }
 0x107   : > { %v646_v38 = vmax.f32 %v566_v33, 0.0  ;;  %v2568_v39 = vadd.f32 %v2567_v36, %v2566_v32  ;;  %v2598_v32 = vadd.f32 %v3375_v23, %v3373_v18  ;;  %v2601_v33 = vadd.f32 %v3383_v31, %v3377_v26 }
 0x108   : > { %v2569_v41 = vpop.f32.mrf.mxu0  ;;  %2743 = vmatpush3.bf16.msra.mxu1 %v2946_v27  ;;  %v3393_v43 = vpop.f32.mrf.mxu1  ;;  %v655_v18 = vmax.f32 %v603_v3, 0.0  ;;  %v656_v23 = vmax.f32 %v606_v8, 0.0  ;;  %v2604_v26 = vadd.f32 %v3391_v40, %v3386_v34 }
 0x109   : > { %v667_v42 = vpack.c.bf16 %v646_v38, %v645_v37  ;;  %2744 = vmatprep.subr.bf16.mxu1 %v2947_v35  ;;  %v571_v46 = vadd.f32 %v2568_v39, %v3353_v56  ;;  %v611_v37 = vadd.f32 %v2598_v32, %v3353_v56  ;;  %v614_v38 = vadd.f32 %v2601_v33, %v3353_v56 }
 0x10a   : > { %v2570_v45 = vpop.f32.mrf.mxu0  ;;  %v2606_v48 = vpop.f32.mrf.mxu1  ;;  %v671_v39 = vpack.c.bf16 %v654_v30, %v653_v29 }
 0x10b   : > { %v2571_v47 = vadd.f32 %v2570_v45, %v2569_v41  ;;  %2720 = vmatprep.mubr.bf16.mxu1 %v667_v42  ;;  %v647_v59 = vmax.f32 %v571_v46, 0.0  ;;  %v2607_v31 = vadd.f32 %v2606_v48, %v3393_v43  ;;  %v658_v45 = vmax.f32 %v614_v38, 0.0 }
 0x10c   : > { %v2572_v49 = vpop.f32.mrf.mxu0  ;;  %2745 = vmatpush3.bf16.msra.mxu1 %v2947_v35  ;;  %v3400_v52 = vpop.f32.mrf.mxu1 }
 0x10d   : > { %v574_v51 = vadd.f32 %v2571_v47, %v3353_v56  ;;  %2746 = vmatprep.subr.bf16.mxu1 %v2948_v44 }
 0x10e   : > { %v2573_v57 = vpop.f32.mrf.mxu0  ;;  %v2609_v1 = vpop.f32.mrf.mxu1 }
 0x10f   : > { %v648_v61 = vmax.f32 %v574_v51, 0.0  ;;  %v2574_v62 = vadd.f32 %v2573_v57, %v2572_v49  ;;  %v2610_v46 = vadd.f32 %v2609_v1, %v3400_v52  ;;  %v619_v51 = vadd.f32 %v2604_v26, %v3353_v56 }
 0x110   : > { %v2575_v63 = vpop.f32.mrf.mxu0  ;;  %2747 = vmatpush3.bf16.msra.mxu1 %v2948_v44  ;;  %v2611_v13 = vpop.f32.mrf.mxu1  ;;  %v657_v44 = vmax.f32 %v611_v37, 0.0  ;;  %v672_v57 = vpack.c.bf16 %v656_v23, %v655_v18 }
 0x111   : > { %v668_v2 = vpack.c.bf16 %v648_v61, %v647_v59  ;;  %2748 = vmatprep.subr.bf16.mxu1 %v2949_v55  ;;  %v579_v6 = vadd.f32 %v2574_v62, %v3353_v56  ;;  %v627_v59 = vadd.f32 %v2610_v46, %v3353_v56  ;;  %v659_v43 = vmax.f32 %v619_v51, 0.0 }
 0x112   : > { %v2576_v5 = vpop.f32.mrf.mxu0  ;;  %v2612_v25 = vpop.f32.mrf.mxu1  ;;  %v673_v40 = vpack.c.bf16 %v658_v45, %v657_v44 }
 0x113   : > { %v2577_v7 = vadd.f32 %v2576_v5, %v2575_v63  ;;  %2721 = vmatmul.mubr.bf16.gmra.mxu1 %v668_v2  ;;  %v649_v17 = vmax.f32 %v579_v6, 0.0  ;;  %v2613_v47 = vadd.f32 %v2612_v25, %v2611_v13  ;;  %v661_v2 = vmax.f32 %v627_v59, 0.0  ;;  %v2952_v13 = vld [vmem:[%s3764_s2 + $0x40] sm:$0xff]  }
 0x114   : > { %v2578_v12 = vpop.f32.mrf.mxu0  ;;  %2749 = vmatpush3.bf16.msra.mxu1 %v2949_v55  ;;  %v2614_v35 = vpop.f32.mrf.mxu1  ;;  %v622_v55 = vadd.f32 %v2607_v31, %v3353_v56 }
 0x115   : > { %v582_v14 = vadd.f32 %v2577_v7, %v3353_v56  ;;  %2750 = vmatprep.subr.bf16.mxu1 %v2950_v4  ;;  %v630_v61 = vadd.f32 %v2613_v47, %v3353_v56 }
 0x116   : > { %v2579_v16 = vpop.f32.mrf.mxu0  ;;  %v2615_v41 = vpop.f32.mrf.mxu1  ;;  %v660_v48 = vmax.f32 %v622_v55, 0.0 }
 0x117   : > { %v650_v19 = vmax.f32 %v582_v14, 0.0  ;;  %v2580_v20 = vadd.f32 %v2579_v16, %v2578_v12  ;;  %v2616_v62 = vadd.f32 %v2615_v41, %v2614_v35  ;;  %v662_v52 = vmax.f32 %v630_v61, 0.0  ;;  %v2951_v12 = vld [vmem:[%s3764_s2 + $0x48] sm:$0xff]   ;;  %v2954_v14 = vld [vmem:[%s3764_s2 + $0xb0] sm:$0xff]  }
 0x118   : > { %v2581_v24 = vpop.f32.mrf.mxu0  ;;  %2751 = vmatpush3.bf16.msra.mxu1 %v2950_v4  ;;  %v2617_v49 = vpop.f32.mrf.mxu1  ;;  %v674_v5 = vpack.c.bf16 %v660_v48, %v659_v43  ;;  %v2955_v16 = vld [vmem:[%s3764_s2 + $0xa8] sm:$0xff]  }
 0x119   : > { %v669_v54 = vpack.c.bf16 %v650_v19, %v649_v17  ;;  %v587_v27 = vadd.f32 %v2580_v20, %v3353_v56  ;;  %v635_v1 = vadd.f32 %v2616_v62, %v3353_v56  ;;  %v675_v6 = vpack.c.bf16 %v662_v52, %v661_v2  ;;  %2752 = vmatprep.subr.bf16.mxu1 %v2951_v12  ;;  %v2956_v17 = vld [vmem:[%s3764_s2 + $0xa0] sm:$0xff]   ;;  %v2957_v19 = vld [vmem:[%s3764_s2 + $0x98] sm:$0xff]   ;;  %v2958_v20 = vld [vmem:[%s3764_s2 + $0x90] sm:$0xff]  }
 0x11a   : > { %v2582_v58 = vpop.f32.mrf.mxu0  ;;  %v2618_v34 = vpop.f32.mrf.mxu1 }
 0x11b   : > { %v2583_v28 = vadd.f32 %v2582_v58, %v2581_v24  ;;  %2724 = vmatprep.mubr.bf16.mxu1 %v669_v54  ;;  %v651_v11 = vmax.f32 %v587_v27, 0.0  ;;  %v2619_v63 = vadd.f32 %v2618_v34, %v2617_v49  ;;  %v663_v7 = vmax.f32 %v635_v1, 0.0 }
 0x11c   : > { %2753 = vmatpush3.bf16.msra.mxu1 %v2951_v12  ;;  %v3466_v24 = vrot.slane %v3348_v53, %v695_v21 }
 0x11d   : > { %v590_v36 = vadd.f32 %v2583_v28, %v3353_v56  ;;  %v638_v4 = vadd.f32 %v2619_v63, %v3353_v56  ;;  %2754 = vmatprep.subr.bf16.mxu1 %v2952_v13  ;;  %v2953_v56 = vld [vmem:[%s3764_s2 + $0xb8] sm:$0xff]  }
 0x11e   : > { %2780 = vmatprep.subr.bf16.mxu0 %v2953_v56 }
 0x11f   : > { %v652_v15 = vmax.f32 %v590_v36, 0.0  ;;  %v664_v9 = vmax.f32 %v638_v4, 0.0  ;;  %2781 = vmatpush3.bf16.msra.mxu0 %v2953_v56 }
 0x120   : > { %2755 = vmatpush3.bf16.msra.mxu1 %v2952_v13  ;;  %2782 = vmatprep.subr.bf16.mxu0 %v2954_v14 }
 0x121   : > { %v670_v42 = vpack.c.bf16 %v652_v15, %v651_v11  ;;  %v676_v10 = vpack.c.bf16 %v664_v9, %v663_v7 }
 0x123   : > { %2725 = vmatmul.mubr.bf16.gmra.mxu1 %v670_v42  ;;  %2783 = vmatpush3.bf16.msra.mxu0 %v2954_v14 }
 0x124   : > { %2728 = vmatprep.mubr.bf16.mxu1 %v671_v39  ;;  %2784 = vmatprep.subr.bf16.mxu0 %v2955_v16 }
 0x127   : > { %2785 = vmatpush3.bf16.msra.mxu0 %v2955_v16 }
 0x128   : > { %2786 = vmatprep.subr.bf16.mxu0 %v2956_v17 }
 0x12b   : > { %2729 = vmatmul.mubr.bf16.gmra.mxu1 %v672_v57  ;;  %2787 = vmatpush3.bf16.msra.mxu0 %v2956_v17 }
 0x12c   : > { %2732 = vmatprep.mubr.bf16.mxu1 %v673_v40  ;;  %2788 = vmatprep.subr.bf16.mxu0 %v2957_v19 }
 0x12f   : > { %2789 = vmatpush3.bf16.msra.mxu0 %v2957_v19 }
 0x130   : > { %2790 = vmatprep.subr.bf16.mxu0 %v2958_v20 }
 0x133   : > { %2733 = vmatmul.mubr.bf16.gmra.mxu1 %v674_v5  ;;  %2791 = vmatpush3.bf16.msra.mxu0 %v2958_v20 }
 0x134   : > { %2736 = vmatprep.mubr.bf16.mxu1 %v675_v6 }
 0x13b   : > { %2737 = vmatmul.mubr.bf16.gmra.mxu1 %v676_v10 }
 0x1c3   : > { %v2718_v22 = vpop.f32.mrf.mxu1 }
 0x1c4   : > { %v788_v0 = vadd.f32 %v2718_v22, %v3466_v24 }
 0x1c5   : > { %v779_v25 = vpop.f32.mrf.mxu1 }
 0x1c6   : > { %v780_v58 = vadd.f32 %v779_v25, %v3466_v24  ;;  %v876_v33 = vmax.f32 %v788_v0, 0.0 }
 0x1c7   : > { %v2719_v54 = vpop.f32.mrf.mxu1 }
 0x1c8   : > { %v791_v60 = vadd.f32 %v2719_v54, %v3466_v24  ;;  %v874_v30 = vmax.f32 %v780_v58, 0.0 }
 0x1c9   : > { %v782_v27 = vpop.f32.mrf.mxu1 }
 0x1ca   : > { %v783_v28 = vadd.f32 %v782_v27, %v3466_v24  ;;  %v877_v29 = vmax.f32 %v791_v60, 0.0 }
 0x1cc   : > { %v875_v32 = vmax.f32 %v783_v28, 0.0  ;;  %v899_v36 = vpack.c.bf16 %v877_v29, %v876_v33 }
 0x1ce   : > { %v898_v35 = vpack.c.bf16 %v875_v32, %v874_v30 }
 0x1d0   : > { %2756 = vmatprep.mubr.bf16.mxu1 %v898_v35 }
 0x1d1   : > { %2757 = vmatmul.mubr.bf16.vlgmr.msra.gmra.mxu1 %v899_v36 }
 0x1d3   : > { %v2722_v3 = vpop.f32.mrf.mxu1 }
 0x1d4   : > { %v804_v38 = vadd.f32 %v2722_v3, %v3466_v24 }
 0x1d5   : > { %v795_v8 = vpop.f32.mrf.mxu1 }
 0x1d6   : > { %v796_v15 = vadd.f32 %v795_v8, %v3466_v24  ;;  %v880_v26 = vmax.f32 %v804_v38, 0.0 }
 0x1d7   : > { %v2723_v11 = vpop.f32.mrf.mxu1 }
 0x1d8   : > { %v807_v37 = vadd.f32 %v2723_v11, %v3466_v24  ;;  %v878_v18 = vmax.f32 %v796_v15, 0.0 }
 0x1d9   : > { %v798_v39 = vpop.f32.mrf.mxu1 }
 0x1da   : > { %v799_v41 = vadd.f32 %v798_v39, %v3466_v24  ;;  %v881_v42 = vmax.f32 %v807_v37, 0.0 }
 0x1dc   : > { %v879_v23 = vmax.f32 %v799_v41, 0.0  ;;  %v901_v44 = vpack.c.bf16 %v881_v42, %v880_v26  ;;  %v2962_v26 = vld [vmem:[%s3764_s2 + $0xf0] sm:$0xff]  }
 0x1de   : > { %v900_v31 = vpack.c.bf16 %v879_v23, %v878_v18  ;;  %v2959_v18 = vld [vmem:[%s3764_s2 + $0x88] sm:$0xff]   ;;  %v2960_v23 = vld [vmem:[%s3764_s2 + $0x80] sm:$0xff]  }
 0x1df   : > { %2792 = vmatprep.subr.bf16.mxu0 %v2959_v18 }
 0x1e0   : > { %2760 = vmatprep.mubr.bf16.mxu1 %v900_v31  ;;  %2793 = vmatpush3.bf16.msra.mxu0 %v2959_v18  ;;  %v2963_v31 = vld [vmem:[%s3764_s2 + $0xe8] sm:$0xff]  }
 0x1e1   : > { %2761 = vmatmul.mubr.bf16.gmra.mxu1 %v901_v44  ;;  %2794 = vmatprep.subr.bf16.mxu0 %v2960_v23  ;;  %v2964_v44 = vld [vmem:[%s3764_s2 + $0xe0] sm:$0xff]  }
 0x1e3   : > { %v2726_v45 = vpop.f32.mrf.mxu1 }
 0x1e4   : > { %v820_v55 = vadd.f32 %v2726_v45, %v3466_v24  ;;  %2795 = vmatpush3.bf16.msra.mxu0 %v2960_v23  ;;  %v2965_v45 = vld [vmem:[%s3764_s2 + $0xd8] sm:$0xff]  }
 0x1e5   : > { %v811_v46 = vpop.f32.mrf.mxu1 }
 0x1e6   : > { %v812_v49 = vadd.f32 %v811_v46, %v3466_v24  ;;  %v884_v48 = vmax.f32 %v820_v55, 0.0  ;;  %v2966_v46 = vld [vmem:[%s3764_s2 + $0xd0] sm:$0xff]  }
 0x1e7   : > { %v2727_v47 = vpop.f32.mrf.mxu1 }
 0x1e8   : > { %v823_v51 = vadd.f32 %v2727_v47, %v3466_v24  ;;  %v882_v40 = vmax.f32 %v812_v49, 0.0  ;;  %v929_v47 = vsub.s32 2, %v3342_v50 }
 0x1e9   : > { %v814_v57 = vpop.f32.mrf.mxu1 }
 0x1ea   : > { %v815_v59 = vadd.f32 %v814_v57, %v3466_v24  ;;  %v885_v61 = vmax.f32 %v823_v51, 0.0  ;;  %v3518_v51 = vrot.slane %v3348_v53, %v929_v47 }
 0x1eb   : > { %v2730_v34 = vpop.f32.mrf.mxu1 }
 0x1ec   : > { %v883_v43 = vmax.f32 %v815_v59, 0.0  ;;  %v903_v2 = vpack.c.bf16 %v885_v61, %v884_v48  ;;  %v836_v5 = vadd.f32 %v2730_v34, %v3466_v24 }
 0x1ed   : > { %v827_v62 = vpop.f32.mrf.mxu1 }
 0x1ee   : > { %v902_v63 = vpack.c.bf16 %v883_v43, %v882_v40  ;;  %v828_v1 = vadd.f32 %v827_v62, %v3466_v24  ;;  %v888_v56 = vmax.f32 %v836_v5, 0.0 }
 0x1ef   : > { %v2731_v52 = vpop.f32.mrf.mxu1 }
 0x1f0   : > { %v839_v4 = vadd.f32 %v2731_v52, %v3466_v24  ;;  %2764 = vmatprep.mubr.bf16.mxu1 %v902_v63  ;;  %v886_v12 = vmax.f32 %v828_v1, 0.0 }
 0x1f1   : > { %v830_v6 = vpop.f32.mrf.mxu1  ;;  %2765 = vmatmul.mubr.bf16.gmra.mxu1 %v903_v2 }
 0x1f2   : > { %v831_v7 = vadd.f32 %v830_v6, %v3466_v24  ;;  %v889_v9 = vmax.f32 %v839_v4, 0.0 }
 0x1f3   : > { %v2734_v10 = vpop.f32.mrf.mxu1 }
 0x1f4   : > { %v887_v13 = vmax.f32 %v831_v7, 0.0  ;;  %v852_v14 = vadd.f32 %v2734_v10, %v3466_v24  ;;  %v905_v20 = vpack.c.bf16 %v889_v9, %v888_v56 }
 0x1f5   : > { %v843_v16 = vpop.f32.mrf.mxu1 }
 0x1f6   : > { %v904_v17 = vpack.c.bf16 %v887_v13, %v886_v12  ;;  %v844_v19 = vadd.f32 %v843_v16, %v3466_v24  ;;  %v892_v25 = vmax.f32 %v852_v14, 0.0 }
 0x1f7   : > { %v2735_v21 = vpop.f32.mrf.mxu1 }
 0x1f8   : > { %v855_v22 = vadd.f32 %v2735_v21, %v3466_v24  ;;  %2768 = vmatprep.mubr.bf16.mxu1 %v904_v17  ;;  %v890_v58 = vmax.f32 %v844_v19, 0.0 }
 0x1f9   : > { %v846_v54 = vpop.f32.mrf.mxu1  ;;  %2769 = vmatmul.mubr.bf16.gmra.mxu1 %v905_v20 }
 0x1fa   : > { %v893_v60 = vmax.f32 %v855_v22, 0.0  ;;  %v847_v0 = vadd.f32 %v846_v54, %v3466_v24 }
 0x1fb   : > { %v2738_v27 = vpop.f32.mrf.mxu1 }
 0x1fc   : > { %v891_v28 = vmax.f32 %v847_v0, 0.0  ;;  %v907_v29 = vpack.c.bf16 %v893_v60, %v892_v25  ;;  %v868_v30 = vadd.f32 %v2738_v27, %v3466_v24 }
 0x1fd   : > { %v859_v32 = vpop.f32.mrf.mxu1 }
 0x1fe   : > { %v906_v33 = vpack.c.bf16 %v891_v28, %v890_v58  ;;  %v860_v35 = vadd.f32 %v859_v32, %v3466_v24  ;;  %v896_v8 = vmax.f32 %v868_v30, 0.0 }
 0x1ff   : > { %v2739_v36 = vpop.f32.mrf.mxu1 }
 0x200   : > { %v871_v3 = vadd.f32 %v2739_v36, %v3466_v24  ;;  %2772 = vmatprep.mubr.bf16.mxu1 %v906_v33  ;;  %v894_v15 = vmax.f32 %v860_v35, 0.0 }
 0x201   : > { %v862_v11 = vpop.f32.mrf.mxu1  ;;  %2773 = vmatmul.mubr.bf16.gmra.mxu1 %v907_v29 }
 0x202   : > { %v897_v37 = vmax.f32 %v871_v3, 0.0  ;;  %v863_v38 = vadd.f32 %v862_v11, %v3466_v24  ;;  %v2961_v24 = vld [vmem:[%s3764_s2 + $0xf8] sm:$0xff]  }
 0x203   : > { %2820 = vmatprep.subr.bf16.mxu1 %v2961_v24 }
 0x204   : > { %v895_v39 = vmax.f32 %v863_v38, 0.0  ;;  %v909_v41 = vpack.c.bf16 %v897_v37, %v896_v8  ;;  %2821 = vmatpush3.bf16.msra.mxu1 %v2961_v24 }
 0x205   : > { %2822 = vmatprep.subr.bf16.mxu1 %v2962_v26 }
 0x206   : > { %v908_v42 = vpack.c.bf16 %v895_v39, %v894_v15 }
 0x208   : > { %2776 = vmatprep.mubr.bf16.mxu1 %v908_v42  ;;  %2823 = vmatpush3.bf16.msra.mxu1 %v2962_v26 }
 0x209   : > { %2777 = vmatmul.mubr.bf16.gmra.mxu1 %v909_v41  ;;  %2824 = vmatprep.subr.bf16.mxu1 %v2963_v31 }
 0x20c   : > { %2825 = vmatpush3.bf16.msra.mxu1 %v2963_v31 }
 0x20d   : > { %2826 = vmatprep.subr.bf16.mxu1 %v2964_v44 }
 0x210   : > { %2827 = vmatpush3.bf16.msra.mxu1 %v2964_v44 }
 0x211   : > { %2828 = vmatprep.subr.bf16.mxu1 %v2965_v45 }
 0x214   : > { %2829 = vmatpush3.bf16.msra.mxu1 %v2965_v45 }
 0x215   : > { %2830 = vmatprep.subr.bf16.mxu1 %v2966_v46 }
 0x218   : > { %2831 = vmatpush3.bf16.msra.mxu1 %v2966_v46 }
 0x291   : > { %v2758_v49 = vpop.f32.mrf.mxu1 }
 0x292   : > { %v1022_v34 = vadd.f32 %v2758_v49, %v3518_v51 }
 0x293   : > { %v1013_v55 = vpop.f32.mrf.mxu1 }
 0x294   : > { %v1014_v59 = vadd.f32 %v1013_v55, %v3518_v51  ;;  %v1110_v2 = vmax.f32 %v1022_v34, 0.0 }
 0x295   : > { %v2759_v57 = vpop.f32.mrf.mxu1 }
 0x296   : > { %v1025_v61 = vadd.f32 %v2759_v57, %v3518_v51  ;;  %v1108_v62 = vmax.f32 %v1014_v59, 0.0 }
 0x297   : > { %v1016_v40 = vpop.f32.mrf.mxu1 }
 0x298   : > { %v1017_v43 = vadd.f32 %v1016_v40, %v3518_v51  ;;  %v1111_v48 = vmax.f32 %v1025_v61, 0.0 }
 0x29a   : > { %v1109_v63 = vmax.f32 %v1017_v43, 0.0  ;;  %v1133_v1 = vpack.c.bf16 %v1111_v48, %v1110_v2 }
 0x29c   : > { %v1132_v52 = vpack.c.bf16 %v1109_v63, %v1108_v62 }
 0x29e   : > { %2796 = vmatprep.mubr.bf16.mxu0 %v1132_v52 }
 0x29f   : > { %2797 = vmatmul.mubr.bf16.vlgmr.msra.gmra.mxu0 %v1133_v1 }
 0x2a1   : > { %v2762_v4 = vpop.f32.mrf.mxu1 }
 0x2a2   : > { %v1038_v10 = vadd.f32 %v2762_v4, %v3518_v51 }
 0x2a3   : > { %v1029_v5 = vpop.f32.mrf.mxu1 }
 0x2a4   : > { %v1030_v7 = vadd.f32 %v1029_v5, %v3518_v51  ;;  %v1114_v17 = vmax.f32 %v1038_v10, 0.0 }
 0x2a5   : > { %v2763_v6 = vpop.f32.mrf.mxu1 }
 0x2a6   : > { %v1041_v9 = vadd.f32 %v2763_v6, %v3518_v51  ;;  %v1112_v14 = vmax.f32 %v1030_v7, 0.0 }
 0x2a7   : > { %v1032_v12 = vpop.f32.mrf.mxu1 }
 0x2a8   : > { %v1033_v13 = vadd.f32 %v1032_v12, %v3518_v51  ;;  %v1115_v56 = vmax.f32 %v1041_v9, 0.0 }
 0x2aa   : > { %v1113_v16 = vmax.f32 %v1033_v13, 0.0  ;;  %v1135_v20 = vpack.c.bf16 %v1115_v56, %v1114_v17  ;;  %v2971_v17 = vld [vmem:[%s3765_s3 + $0x74] ss:$8 sps:$4 sm:$0xff]  }
 0x2ab   : > { %1716 = vmatprep.subr.bf16.mxu0 %v2971_v17 }
 0x2ac   : > { %v1134_v19 = vpack.c.bf16 %v1113_v16, %v1112_v14  ;;  %v2967_v14 = vld [vmem:[%s3764_s2 + $0xc8] sm:$0xff]   ;;  %v2968_v16 = vld [vmem:[%s3764_s2 + $0xc0] sm:$0xff]  }
 0x2ad   : > { %2832 = vmatprep.subr.bf16.mxu1 %v2967_v14 }
 0x2ae   : > { %2800 = vmatprep.mubr.bf16.mxu0 %v1134_v19  ;;  %2833 = vmatpush3.bf16.msra.mxu1 %v2967_v14  ;;  %v2974_v19 = vld [vmem:[%s3765_s3 + $0x64] ss:$8 sps:$4 sm:$0xff]  }
 0x2af   : > { %2801 = vmatmul.mubr.bf16.gmra.mxu0 %v1135_v20  ;;  %2834 = vmatprep.subr.bf16.mxu1 %v2968_v16  ;;  %v2972_v20 = vld [vmem:[%s3765_s3 + $0x60] ss:$8 sps:$4 sm:$0xff]  }
 0x2b1   : > { %v2766_v21 = vpop.f32.mrf.mxu1 }
 0x2b2   : > { %v1054_v60 = vadd.f32 %v2766_v21, %v3518_v51  ;;  %2835 = vmatpush3.bf16.msra.mxu1 %v2968_v16  ;;  %v2977_v21 = vld [vmem:[%s3765_s3 + $0x54] ss:$8 sps:$4 sm:$0xff]  }
 0x2b3   : > { %v1045_v22 = vpop.f32.mrf.mxu1 }
 0x2b4   : > { %v1046_v54 = vadd.f32 %v1045_v22, %v3518_v51  ;;  %v1118_v33 = vmax.f32 %v1054_v60, 0.0  ;;  %v2975_v22 = vld [vmem:[%s3765_s3 + $0x50] ss:$8 sps:$4 sm:$0xff]  }
 0x2b5   : > { %v2767_v25 = vpop.f32.mrf.mxu1  ;;  %v2981_v60 = vld [vmem:[%s3765_s3 + $0x30] ss:$8 sps:$4 sm:$0xff]  }
 0x2b6   : > { %v1057_v58 = vadd.f32 %v2767_v25, %v3518_v51  ;;  %v1116_v30 = vmax.f32 %v1046_v54, 0.0  ;;  %v2980_v25 = vld [vmem:[%s3765_s3 + $0x44] ss:$8 sps:$4 sm:$0xff]   ;;  %v2978_v54 = vld [vmem:[%s3765_s3 + $0x40] ss:$8 sps:$4 sm:$0xff]  }
 0x2b7   : > { %v1048_v0 = vpop.f32.mrf.mxu1 }
 0x2b8   : > { %v1049_v27 = vadd.f32 %v1048_v0, %v3518_v51  ;;  %v1119_v28 = vmax.f32 %v1057_v58, 0.0  ;;  %v2983_v58 = vld [vmem:[%s3765_s3 + $0x34] ss:$8 sps:$4 sm:$0xff]   ;;  %v2986_v0 = vld [vmem:[%s3765_s3 + $0x24] ss:$8 sps:$4 sm:$0xff]  }
 0x2b9   : > { %v2770_v29 = vpop.f32.mrf.mxu1 }
 0x2ba   : > { %v1117_v32 = vmax.f32 %v1049_v27, 0.0  ;;  %v1137_v3 = vpack.c.bf16 %v1119_v28, %v1118_v33  ;;  %v1070_v37 = vadd.f32 %v2770_v29, %v3518_v51  ;;  %v2984_v27 = vld [vmem:[%s3765_s3 + $0x20] ss:$8 sps:$4 sm:$0xff]   ;;  %v1163_v28 = vsub.s32 3, %v3342_v50 }
 0x2bb   : > { %v1061_v35 = vpop.f32.mrf.mxu1 }
 0x2bc   : > { %v1136_v36 = vpack.c.bf16 %v1117_v32, %v1116_v30  ;;  %v1062_v11 = vadd.f32 %v1061_v35, %v3518_v51  ;;  %v1122_v24 = vmax.f32 %v1070_v37, 0.0  ;;  %v3588_v30 = vrot.slane %v3348_v53, %v1163_v28 }
 0x2bd   : > { %v2771_v8 = vpop.f32.mrf.mxu1 }
 0x2be   : > { %v1073_v15 = vadd.f32 %v2771_v8, %v3518_v51  ;;  %2804 = vmatprep.mubr.bf16.mxu0 %v1136_v36  ;;  %v1120_v18 = vmax.f32 %v1062_v11, 0.0 }
 0x2bf   : > { %v1064_v38 = vpop.f32.mrf.mxu1  ;;  %2805 = vmatmul.mubr.bf16.gmra.mxu0 %v1137_v3 }
 0x2c0   : > { %v1065_v39 = vadd.f32 %v1064_v38, %v3518_v51  ;;  %v1123_v41 = vmax.f32 %v1073_v15, 0.0 }
 0x2c1   : > { %v2774_v42 = vpop.f32.mrf.mxu1 }
 0x2c2   : > { %v1121_v23 = vmax.f32 %v1065_v39, 0.0  ;;  %v1139_v44 = vpack.c.bf16 %v1123_v41, %v1122_v24  ;;  %v1086_v45 = vadd.f32 %v2774_v42, %v3518_v51 }
 0x2c3   : > { %v1077_v26 = vpop.f32.mrf.mxu1 }
 0x2c4   : > { %v1138_v31 = vpack.c.bf16 %v1121_v23, %v1120_v18  ;;  %v1078_v47 = vadd.f32 %v1077_v26, %v3518_v51  ;;  %v1126_v59 = vmax.f32 %v1086_v45, 0.0 }
 0x2c5   : > { %v2775_v46 = vpop.f32.mrf.mxu1 }
 0x2c6   : > { %v1089_v49 = vadd.f32 %v2775_v46, %v3518_v51  ;;  %2808 = vmatprep.mubr.bf16.mxu0 %v1138_v31  ;;  %v1124_v40 = vmax.f32 %v1078_v47, 0.0 }
 0x2c7   : > { %v1080_v55 = vpop.f32.mrf.mxu1  ;;  %2809 = vmatmul.mubr.bf16.gmra.mxu0 %v1139_v44 }
 0x2c8   : > { %v1081_v57 = vadd.f32 %v1080_v55, %v3518_v51  ;;  %v1127_v61 = vmax.f32 %v1089_v49, 0.0 }
 0x2c9   : > { %v2778_v34 = vpop.f32.mrf.mxu1 }
 0x2ca   : > { %v1125_v43 = vmax.f32 %v1081_v57, 0.0  ;;  %v1102_v48 = vadd.f32 %v2778_v34, %v3518_v51  ;;  %v1141_v52 = vpack.c.bf16 %v1127_v61, %v1126_v59 }
 0x2cb   : > { %v1093_v62 = vpop.f32.mrf.mxu1 }
 0x2cc   : > { %v1140_v63 = vpack.c.bf16 %v1125_v43, %v1124_v40  ;;  %v1094_v2 = vadd.f32 %v1093_v62, %v3518_v51  ;;  %v1130_v5 = vmax.f32 %v1102_v48, 0.0 }
 0x2cd   : > { %v2779_v1 = vpop.f32.mrf.mxu1 }
 0x2ce   : > { %v1105_v4 = vadd.f32 %v2779_v1, %v3518_v51  ;;  %2812 = vmatprep.mubr.bf16.mxu0 %v1140_v63  ;;  %v1128_v7 = vmax.f32 %v1094_v2, 0.0 }
 0x2cf   : > { %v1096_v6 = vpop.f32.mrf.mxu1  ;;  %2813 = vmatmul.mubr.bf16.gmra.mxu0 %v1141_v52 }
 0x2d0   : > { %v1131_v9 = vmax.f32 %v1105_v4, 0.0  ;;  %v1097_v10 = vadd.f32 %v1096_v6, %v3518_v51  ;;  %v2969_v51 = vld [vmem:[%s3765_s3 + $0x70] ss:$8 sps:$4 sm:$0xff]  }
 0x2d1   : > { %1717 = vmatpush1.bf16.msra.mxu0 %v2969_v51 }
 0x2d2   : > { %v1129_v12 = vmax.f32 %v1097_v10, 0.0  ;;  %v1143_v13 = vpack.c.bf16 %v1131_v9, %v1130_v5  ;;  %1718 = vmatprep.subr.bf16.mxu0 %v2974_v19 }
 0x2d4   : > { %v1142_v56 = vpack.c.bf16 %v1129_v12, %v1128_v7 }
 0x2d5   : > { %1719 = vmatpush1.bf16.msra.mxu0 %v2972_v20 }
 0x2d6   : > { %2816 = vmatprep.mubr.bf16.mxu0 %v1142_v56  ;;  %1720 = vmatprep.subr.bf16.mxu0 %v2977_v21 }
 0x2d7   : > { %2817 = vmatmul.mubr.bf16.gmra.mxu0 %v1143_v13 }
 0x2d9   : > { %1721 = vmatpush1.bf16.msra.mxu0 %v2975_v22 }
 0x2da   : > { %1722 = vmatprep.subr.bf16.mxu0 %v2980_v25 }
 0x2dd   : > { %1723 = vmatpush1.bf16.msra.mxu0 %v2978_v54 }
 0x2de   : > { %1724 = vmatprep.subr.bf16.mxu0 %v2983_v58 }
 0x2e1   : > { %1725 = vmatpush1.bf16.msra.mxu0 %v2981_v60 }
 0x2e2   : > { %1726 = vmatprep.subr.bf16.mxu0 %v2986_v0 }
 0x2e5   : > { %1727 = vmatpush1.bf16.msra.mxu0 %v2984_v27 }
 0x35f   : > { %v2798_v29 = vpop.f32.mrf.mxu0 }
 0x360   : > { %v1256_v3 = vadd.f32 %v2798_v29, %v3588_v30 }
 0x361   : > { %v1247_v32 = vpop.f32.mrf.mxu0 }
 0x362   : > { %v1248_v35 = vadd.f32 %v1247_v32, %v3588_v30  ;;  %v1344_v39 = vmax.f32 %v1256_v3, 0.0 }
 0x363   : > { %v2799_v33 = vpop.f32.mrf.mxu0 }
 0x364   : > { %v1259_v36 = vadd.f32 %v2799_v33, %v3588_v30  ;;  %v1342_v37 = vmax.f32 %v1248_v35, 0.0 }
 0x365   : > { %v1250_v8 = vpop.f32.mrf.mxu0 }
 0x366   : > { %v1251_v11 = vadd.f32 %v1250_v8, %v3588_v30  ;;  %v1345_v15 = vmax.f32 %v1259_v36, 0.0 }
 0x368   : > { %v1343_v38 = vmax.f32 %v1251_v11, 0.0  ;;  %v1367_v42 = vpack.c.bf16 %v1345_v15, %v1344_v39 }
 0x36a   : > { %v1366_v41 = vpack.c.bf16 %v1343_v38, %v1342_v37 }
 0x36c   : > { %2836 = vmatprep.mubr.bf16.mxu1 %v1366_v41 }
 0x36d   : > { %2837 = vmatmul.mubr.bf16.vlgmr.msra.gmra.mxu1 %v1367_v42 }
 0x36f   : > { %v2802_v53 = vpop.f32.mrf.mxu0 }
 0x370   : > { %v1272_v31 = vadd.f32 %v2802_v53, %v3588_v30 }
 0x371   : > { %v1263_v18 = vpop.f32.mrf.mxu0 }
 0x372   : > { %v1264_v24 = vadd.f32 %v1263_v18, %v3588_v30  ;;  %v1348_v55 = vmax.f32 %v1272_v31, 0.0 }
 0x373   : > { %v2803_v23 = vpop.f32.mrf.mxu0 }
 0x374   : > { %v1275_v26 = vadd.f32 %v2803_v23, %v3588_v30  ;;  %v1346_v47 = vmax.f32 %v1264_v24, 0.0 }
 0x375   : > { %v1266_v44 = vpop.f32.mrf.mxu0 }
 0x376   : > { %v1267_v45 = vadd.f32 %v1266_v44, %v3588_v30  ;;  %v1349_v46 = vmax.f32 %v1275_v26, 0.0 }
 0x378   : > { %v1347_v49 = vmax.f32 %v1267_v45, 0.0  ;;  %v1369_v59 = vpack.c.bf16 %v1349_v46, %v1348_v55  ;;  %v2987_v46 = vld [vmem:[%s3765_s3 + $0x10] ss:$8 sps:$4 sm:$0xff]   ;;  %v3194_v55 = vmov 0  }
 0x379   : > { %1748 = vmatprep.mubr.bf16.mxu0 %v3194_v55 }
 0x37a   : > { %v1368_v57 = vpack.c.bf16 %v1347_v49, %v1346_v47  ;;  %v2989_v47 = vld [vmem:[%s3765_s3 + $0x14] ss:$8 sps:$4 sm:$0xff]   ;;  %v2990_v49 = vld [vmem:[%s3765_s3] ss:$8 sps:$4 sm:$0xff]  }
 0x37b   : > { %1728 = vmatprep.subr.bf16.mxu0 %v2989_v47 }
 0x37c   : > { %2840 = vmatprep.mubr.bf16.mxu1 %v1368_v57  ;;  %1729 = vmatpush1.bf16.msra.mxu0 %v2987_v46  ;;  %v1397_v57 = vsub.s32 4, %v3342_v50 }
 0x37d   : > { %2841 = vmatmul.mubr.bf16.gmra.mxu1 %v1369_v59 }
 0x37f   : > { %v2806_v61 = vpop.f32.mrf.mxu0 }
 0x380   : > { %v1288_v62 = vadd.f32 %v2806_v61, %v3588_v30 }
 0x381   : > { %v1279_v34 = vpop.f32.mrf.mxu0 }
 0x382   : > { %v1280_v43 = vadd.f32 %v1279_v34, %v3588_v30  ;;  %v1352_v6 = vmax.f32 %v1288_v62, 0.0  ;;  %v3631_v34 = vld [vmem:[%s3766_s4] sm:$0xff] }
 0x383   : > { %v2807_v40 = vpop.f32.mrf.mxu0 }
 0x384   : > { %v1291_v48 = vadd.f32 %v2807_v40, %v3588_v30  ;;  %v1350_v4 = vmax.f32 %v1280_v43, 0.0  ;;  %v3634_v40 = vrot.slane %v3631_v34, %v1397_v57 }
 0x385   : > { %v1282_v63 = vpop.f32.mrf.mxu0 }
 0x386   : > { %v1283_v2 = vadd.f32 %v1282_v63, %v3588_v30  ;;  %v1353_v52 = vmax.f32 %v1291_v48, 0.0 }
 0x387   : > { %v2810_v1 = vpop.f32.mrf.mxu0 }
 0x388   : > { %v1351_v5 = vmax.f32 %v1283_v2, 0.0  ;;  %v1371_v10 = vpack.c.bf16 %v1353_v52, %v1352_v6  ;;  %v1304_v14 = vadd.f32 %v2810_v1, %v3588_v30 }
 0x389   : > { %v1295_v7 = vpop.f32.mrf.mxu0 }
 0x38a   : > { %v1370_v9 = vpack.c.bf16 %v1351_v5, %v1350_v4  ;;  %v1296_v13 = vadd.f32 %v1295_v7, %v3588_v30  ;;  %v1356_v22 = vmax.f32 %v1304_v14, 0.0 }
 0x38b   : > { %v2811_v12 = vpop.f32.mrf.mxu0 }
 0x38c   : > { %v1307_v56 = vadd.f32 %v2811_v12, %v3588_v30  ;;  %2844 = vmatprep.mubr.bf16.mxu1 %v1370_v9  ;;  %v1354_v20 = vmax.f32 %v1296_v13, 0.0 }
 0x38d   : > { %v1298_v16 = vpop.f32.mrf.mxu0  ;;  %2845 = vmatmul.mubr.bf16.gmra.mxu1 %v1371_v10 }
 0x38e   : > { %v1299_v51 = vadd.f32 %v1298_v16, %v3588_v30  ;;  %v1357_v17 = vmax.f32 %v1307_v56, 0.0 }
 0x38f   : > { %v2814_v19 = vpop.f32.mrf.mxu0 }
 0x390   : > { %v1355_v21 = vmax.f32 %v1299_v51, 0.0  ;;  %v1373_v58 = vpack.c.bf16 %v1357_v17, %v1356_v22  ;;  %v1320_v28 = vadd.f32 %v2814_v19, %v3588_v30 }
 0x391   : > { %v1311_v25 = vpop.f32.mrf.mxu0 }
 0x392   : > { %v1372_v54 = vpack.c.bf16 %v1355_v21, %v1354_v20  ;;  %v1312_v0 = vadd.f32 %v1311_v25, %v3588_v30  ;;  %v1360_v8 = vmax.f32 %v1320_v28, 0.0 }
 0x393   : > { %v2815_v60 = vpop.f32.mrf.mxu0 }
 0x394   : > { %v1323_v27 = vadd.f32 %v2815_v60, %v3588_v30  ;;  %2848 = vmatprep.mubr.bf16.mxu1 %v1372_v54  ;;  %v1358_v36 = vmax.f32 %v1312_v0, 0.0 }
 0x395   : > { %v1314_v29 = vpop.f32.mrf.mxu0  ;;  %2849 = vmatmul.mubr.bf16.gmra.mxu1 %v1373_v58 }
 0x396   : > { %v1315_v32 = vadd.f32 %v1314_v29, %v3588_v30  ;;  %v1361_v33 = vmax.f32 %v1323_v27, 0.0 }
 0x397   : > { %v2818_v35 = vpop.f32.mrf.mxu0 }
 0x398   : > { %v1359_v3 = vmax.f32 %v1315_v32, 0.0  ;;  %v1375_v37 = vpack.c.bf16 %v1361_v33, %v1360_v8  ;;  %v1336_v38 = vadd.f32 %v2818_v35, %v3588_v30 }
 0x399   : > { %v1327_v11 = vpop.f32.mrf.mxu0 }
 0x39a   : > { %v1374_v15 = vpack.c.bf16 %v1359_v3, %v1358_v36  ;;  %v1328_v41 = vadd.f32 %v1327_v11, %v3588_v30  ;;  %v1364_v23 = vmax.f32 %v1336_v38, 0.0 }
 0x39b   : > { %v2819_v39 = vpop.f32.mrf.mxu0 }
 0x39c   : > { %v1339_v42 = vadd.f32 %v2819_v39, %v3588_v30  ;;  %2852 = vmatprep.mubr.bf16.mxu1 %v1374_v15  ;;  %v1362_v26 = vmax.f32 %v1328_v41, 0.0 }
 0x39d   : > { %v1330_v53 = vpop.f32.mrf.mxu0  ;;  %2853 = vmatmul.mubr.bf16.gmra.mxu1 %v1375_v37 }
 0x39e   : > { %v1331_v18 = vadd.f32 %v1330_v53, %v3588_v30  ;;  %v1365_v24 = vmax.f32 %v1339_v42, 0.0  ;;  %v2992_v30 = vld [vmem:[%s3765_s3 + $0x4] ss:$8 sps:$4 sm:$0xff]  }
 0x39f   : > { %1730 = vmatprep.subr.bf16.mxu0 %v2992_v30 }
 0x3a0   : > { %v1363_v31 = vmax.f32 %v1331_v18, 0.0  ;;  %v1377_v45 = vpack.c.bf16 %v1365_v24, %v1364_v23  ;;  %1731 = vmatpush1.bf16.msra.mxu0 %v2990_v49 }
 0x3a2   : > { %v1376_v44 = vpack.c.bf16 %v1363_v31, %v1362_v26 }
 0x3a4   : > { %2856 = vmatprep.mubr.bf16.mxu1 %v1376_v44 }
 0x3a5   : > { %2857 = vmatmul.mubr.bf16.gmra.mxu1 %v1377_v45 }
 0x42d   : > { %v2838_v59 = vpop.f32.mrf.mxu1 }
 0x42e   : > { %v1490_v5 = vadd.f32 %v2838_v59, %v3634_v40 }
 0x42f   : > { %v1481_v61 = vpop.f32.mrf.mxu1 }
 0x430   : > { %v1482_v48 = vadd.f32 %v1481_v61, %v3634_v40  ;;  %v1578_v9 = vmax.f32 %v1490_v5, 0.0 }
 0x431   : > { %v2839_v43 = vpop.f32.mrf.mxu1 }
 0x432   : > { %v1576_v2 = vmax.f32 %v1482_v48, 0.0  ;;  %v1493_v1 = vadd.f32 %v2839_v43, %v3634_v40 }
 0x433   : > { %v1484_v62 = vpop.f32.mrf.mxu1 }
 0x434   : > { %v1485_v63 = vadd.f32 %v1484_v62, %v3634_v40  ;;  %v1579_v6 = vmax.f32 %v1493_v1, 0.0 }
 0x436   : > { %v1577_v52 = vmax.f32 %v1485_v63, 0.0  ;;  %v1601_v12 = vpack.c.bf16 %v1579_v6, %v1578_v9 }
 0x438   : > { %v1600_v4 = vpack.c.bf16 %v1577_v52, %v1576_v2 }
 0x43a   : > { %1749 = vmatmul.mubr.bf16.vlgmr.msra.gmra.mxu0 %v1600_v4 }
 0x43b   : > { %1758 = vmatprep.mubr.bf16.mxu0 %v3194_v55 }
 0x43d   : > { %v2842_v7 = vpop.f32.mrf.mxu1 }
 0x43e   : > { %v1506_v21 = vadd.f32 %v2842_v7, %v3634_v40 }
 0x43f   : > { %v1497_v10 = vpop.f32.mrf.mxu1 }
 0x440   : > { %v1498_v56 = vadd.f32 %v1497_v10, %v3634_v40  ;;  %v1582_v54 = vmax.f32 %v1506_v21, 0.0  ;;  %v1630_v21 = vsub.s32 5, %v3342_v50 }
 0x441   : > { %v2843_v13 = vpop.f32.mrf.mxu1 }
 0x442   : > { %1759 = vmatmul.mubr.bf16.gmra.mxu0 %v1601_v12  ;;  %v1580_v51 = vmax.f32 %v1498_v56, 0.0  ;;  %v1509_v19 = vadd.f32 %v2843_v13, %v3634_v40 }
 0x443   : > { %v1500_v14 = vpop.f32.mrf.mxu1  ;;  %1768 = vmatprep.mubr.bf16.mxu0 %v3194_v55 }
 0x444   : > { %v1501_v16 = vadd.f32 %v1500_v14, %v3634_v40  ;;  %v1583_v22 = vmax.f32 %v1509_v19, 0.0 }
 0x446   : > { %v1581_v17 = vmax.f32 %v1501_v16, 0.0  ;;  %v1603_v60 = vpack.c.bf16 %v1583_v22, %v1582_v54  ;;  %v235_v22 = vld [vmem:[%s3766_s4 + $0x8] sm:$0xff] }
 0x447   : > { %v3678_v54 = vrot.slane %v235_v22, %v1630_v21 }
 0x448   : > { %v1602_v20 = vpack.c.bf16 %v1581_v17, %v1580_v51 }
 0x44a   : > { %1769 = vmatmul.mubr.bf16.gmra.mxu0 %v1602_v20 }
 0x44b   : > { %1778 = vmatprep.mubr.bf16.mxu0 %v3194_v55 }
 0x44d   : > { %v2846_v25 = vpop.f32.mrf.mxu1 }
 0x44e   : > { %v1522_v15 = vadd.f32 %v2846_v25, %v3634_v40  ;;  %v3676_v25 = vrot.slane %v3631_v34, %v1630_v21 }
 0x44f   : > { %v1513_v58 = vpop.f32.mrf.mxu1 }
 0x450   : > { %v1514_v27 = vadd.f32 %v1513_v58, %v3634_v40  ;;  %v1586_v39 = vmax.f32 %v1522_v15, 0.0 }
 0x451   : > { %v2847_v0 = vpop.f32.mrf.mxu1 }
 0x452   : > { %1779 = vmatmul.mubr.bf16.gmra.mxu0 %v1603_v60  ;;  %v1584_v33 = vmax.f32 %v1514_v27, 0.0  ;;  %v1525_v3 = vadd.f32 %v2847_v0, %v3634_v40 }
 0x453   : > { %v1516_v28 = vpop.f32.mrf.mxu1  ;;  %1788 = vmatprep.mubr.bf16.mxu0 %v3194_v55 }
 0x454   : > { %v1517_v29 = vadd.f32 %v1516_v28, %v3634_v40  ;;  %v1587_v37 = vmax.f32 %v1525_v3, 0.0 }
 0x455   : > { %v2850_v32 = vpop.f32.mrf.mxu1 }
 0x456   : > { %v1585_v35 = vmax.f32 %v1517_v29, 0.0  ;;  %v1605_v41 = vpack.c.bf16 %v1587_v37, %v1586_v39  ;;  %v1538_v46 = vadd.f32 %v2850_v32, %v3634_v40 }
 0x457   : > { %v1529_v36 = vpop.f32.mrf.mxu1 }
 0x458   : > { %v1604_v8 = vpack.c.bf16 %v1585_v35, %v1584_v33  ;;  %v1530_v18 = vadd.f32 %v1529_v36, %v3634_v40  ;;  %v1590_v49 = vmax.f32 %v1538_v46, 0.0 }
 0x459   : > { %v2851_v11 = vpop.f32.mrf.mxu1 }
 0x45a   : > { %1789 = vmatmul.mubr.bf16.gmra.mxu0 %v1604_v8  ;;  %v1588_v26 = vmax.f32 %v1530_v18, 0.0  ;;  %v1541_v31 = vadd.f32 %v2851_v11, %v3634_v40 }
 0x45b   : > { %1798 = vmatprep.mubr.bf16.mxu0 %v3194_v55  ;;  %v1532_v38 = vpop.f32.mrf.mxu1 }
 0x45c   : > { %v1533_v42 = vadd.f32 %v1532_v38, %v3634_v40  ;;  %v1591_v47 = vmax.f32 %v1541_v31, 0.0 }
 0x45d   : > { %v2854_v53 = vpop.f32.mrf.mxu1 }
 0x45e   : > { %v1589_v23 = vmax.f32 %v1533_v42, 0.0  ;;  %v1607_v57 = vpack.c.bf16 %v1591_v47, %v1590_v49  ;;  %v1554_v4 = vadd.f32 %v2854_v53, %v3634_v40 }
 0x45f   : > { %v1545_v24 = vpop.f32.mrf.mxu1 }
 0x460   : > { %v1606_v44 = vpack.c.bf16 %v1589_v23, %v1588_v26  ;;  %v1546_v43 = vadd.f32 %v1545_v24, %v3634_v40  ;;  %v1594_v7 = vmax.f32 %v1554_v4, 0.0 }
 0x461   : > { %v2855_v45 = vpop.f32.mrf.mxu1 }
 0x462   : > { %1799 = vmatmul.mubr.bf16.gmra.mxu0 %v1605_v41  ;;  %v1592_v63 = vmax.f32 %v1546_v43, 0.0  ;;  %v1557_v2 = vadd.f32 %v2855_v45, %v3634_v40 }
 0x463   : > { %1808 = vmatprep.mubr.bf16.mxu0 %v3194_v55  ;;  %v1548_v30 = vpop.f32.mrf.mxu1 }
 0x464   : > { %v1549_v59 = vadd.f32 %v1548_v30, %v3634_v40  ;;  %v1595_v5 = vmax.f32 %v1557_v2, 0.0 }
 0x465   : > { %v2858_v61 = vpop.f32.mrf.mxu1 }
 0x466   : > { %v1593_v48 = vmax.f32 %v1549_v59, 0.0  ;;  %v1609_v9 = vpack.c.bf16 %v1595_v5, %v1594_v7  ;;  %v1570_v51 = vadd.f32 %v2858_v61, %v3634_v40 }
 0x467   : > { %v1561_v62 = vpop.f32.mrf.mxu1 }
 0x468   : > { %v1608_v52 = vpack.c.bf16 %v1593_v48, %v1592_v63  ;;  %v1562_v12 = vadd.f32 %v1561_v62, %v3634_v40  ;;  %v1598_v19 = vmax.f32 %v1570_v51, 0.0 }
 0x469   : > { %v2859_v1 = vpop.f32.mrf.mxu1 }
 0x46a   : > { %1809 = vmatmul.mubr.bf16.gmra.mxu0 %v1606_v44  ;;  %v1596_v56 = vmax.f32 %v1562_v12, 0.0  ;;  %v1573_v14 = vadd.f32 %v2859_v1, %v3634_v40 }
 0x46b   : > { %1818 = vmatprep.mubr.bf16.mxu0 %v3194_v55  ;;  %v1564_v6 = vpop.f32.mrf.mxu1 }
 0x46c   : > { %v1565_v10 = vadd.f32 %v1564_v6, %v3634_v40  ;;  %v1599_v17 = vmax.f32 %v1573_v14, 0.0 }
 0x46e   : > { %v1597_v13 = vmax.f32 %v1565_v10, 0.0  ;;  %v1611_v20 = vpack.c.bf16 %v1599_v17, %v1598_v19 }
 0x470   : > { %v1610_v16 = vpack.c.bf16 %v1597_v13, %v1596_v56 }
 0x472   : > { %1819 = vmatmul.mubr.bf16.gmra.mxu0 %v1607_v57 }
 0x473   : > { %1828 = vmatprep.mubr.bf16.mxu0 %v3194_v55 }
 0x47a   : > { %1829 = vmatmul.mubr.bf16.gmra.mxu0 %v1608_v52 }
 0x47b   : > { %1838 = vmatprep.mubr.bf16.mxu0 %v3194_v55 }
 0x482   : > { %1839 = vmatmul.mubr.bf16.gmra.mxu0 %v1609_v9 }
 0x483   : > { %1848 = vmatprep.mubr.bf16.mxu0 %v3194_v55 }
 0x48a   : > { %1849 = vmatmul.mubr.bf16.gmra.mxu0 %v1610_v16 }
 0x48b   : > { %1858 = vmatprep.mubr.bf16.mxu0 %v3194_v55 }
 0x492   : > { %1859 = vmatmul.mubr.bf16.gmra.mxu0 %v1611_v20 }
 0x4fa   : > { %v1750_v58 = vpop.f32.mrf.mxu0 }
 0x4fb   : > { %v1751_v40 = vadd.f32 %v1750_v58, %v3676_v25 }
 0x4fc   : > { %v1752_v60 = vpop.f32.mrf.mxu0 }
 0x4fd   : > { %v1869_v55 = vsub.f32 0.0, %v1751_v40  ;;  %v1753_v0 = vadd.f32 %v1752_v60, %v3678_v54 }
 0x4fe   : > { %v1754_v27 = vpop.f32.mrf.mxu0 }
 0x4ff   : > { %v1917_v28 = vmul.f32 1.442695, %v1869_v55  ;;  %v1870_v29 = vsub.f32 0.0, %v1753_v0  ;;  %v1755_v50 = vadd.f32 %v1754_v27, %v3676_v25 }
 0x500   : > { %v1756_v32 = vpop.f32.mrf.mxu0 }
 0x501   : > { %2993 = vpow2.f32 %v1917_v28  ;;  %v1919_v33 = vmul.f32 1.442695, %v1870_v29  ;;  %v1871_v35 = vsub.f32 0.0, %v1755_v50  ;;  %v1757_v34 = vadd.f32 %v1756_v32, %v3678_v54 }
 0x502   : > { %v1760_v36 = vpop.f32.mrf.mxu0 }
 0x503   : > { %2995 = vpow2.f32 %v1919_v33  ;;  %v1921_v3 = vmul.f32 1.442695, %v1871_v35  ;;  %v1872_v8 = vsub.f32 0.0, %v1757_v34  ;;  %v1761_v11 = vadd.f32 %v1760_v36, %v3676_v25 }
 0x504   : > { %v1762_v15 = vpop.f32.mrf.mxu0 }
 0x505   : > { %2997 = vpow2.f32 %v1921_v3  ;;  %v1923_v37 = vmul.f32 1.442695, %v1872_v8  ;;  %v1873_v38 = vsub.f32 0.0, %v1761_v11  ;;  %v1763_v39 = vadd.f32 %v1762_v15, %v3678_v54 }
 0x506   : > { %v1764_v41 = vpop.f32.mrf.mxu0 }
 0x507   : > { %2999 = vpow2.f32 %v1923_v37  ;;  %v1925_v42 = vmul.f32 1.442695, %v1873_v38  ;;  %v1874_v53 = vsub.f32 0.0, %v1763_v39  ;;  %v1765_v18 = vadd.f32 %v1764_v41, %v3676_v25 }
 0x508   : > { %v1766_v23 = vpop.f32.mrf.mxu0 }
 0x509   : > { %3001 = vpow2.f32 %v1925_v42  ;;  %v1927_v24 = vmul.f32 1.442695, %v1874_v53  ;;  %v1875_v26 = vsub.f32 0.0, %v1765_v18  ;;  %v1767_v31 = vadd.f32 %v1766_v23, %v3678_v54 }
 0x50a   : > { %v1770_v44 = vpop.f32.mrf.mxu0 }
 0x50b   : > { %3003 = vpow2.f32 %v1927_v24  ;;  %v1929_v45 = vmul.f32 1.442695, %v1875_v26  ;;  %v1876_v46 = vsub.f32 0.0, %v1767_v31  ;;  %v1771_v47 = vadd.f32 %v1770_v44, %v3676_v25 }
 0x50c   : > { %v1772_v30 = vpop.f32.mrf.mxu0 }
 0x50d   : > { %3005 = vpow2.f32 %v1929_v45  ;;  %v1931_v49 = vmul.f32 1.442695, %v1876_v46  ;;  %v1877_v57 = vsub.f32 0.0, %v1771_v47  ;;  %v1773_v59 = vadd.f32 %v1772_v30, %v3678_v54 }
 0x50e   : > { %v2994_v61 = vpop.eup %2993  ;;  %v1774_v43 = vpop.f32.mrf.mxu0 }
 0x50f   : > { %v2013_v48 = vadd.f32 1.0, %v2994_v61  ;;  %3007 = vpow2.f32 %v1931_v49  ;;  %v1933_v62 = vmul.f32 1.442695, %v1877_v57  ;;  %v1878_v63 = vsub.f32 0.0, %v1773_v59 }
 0x510   : > { %v2996_v2 = vpop.eup %2995  ;;  %v1775_v52 = vadd.f32 %v1774_v43, %v3676_v25  ;;  %v1776_v1 = vpop.f32.mrf.mxu0 }
 0x511   : > { %3009 = vrcp.f32 %v2013_v48  ;;  %v2014_v4 = vadd.f32 1.0, %v2996_v2  ;;  %v1935_v5 = vmul.f32 1.442695, %v1878_v63  ;;  %v1777_v6 = vadd.f32 %v1776_v1, %v3678_v54 }
 0x512   : > { %v2998_v7 = vpop.eup %2997  ;;  %3011 = vpow2.f32 %v1933_v62  ;;  %v1879_v9 = vsub.f32 0.0, %v1775_v52  ;;  %v1780_v10 = vpop.f32.mrf.mxu0 }
 0x513   : > { %3013 = vrcp.f32 %v2014_v4  ;;  %v2015_v12 = vadd.f32 1.0, %v2998_v7  ;;  %v1880_v13 = vsub.f32 0.0, %v1777_v6  ;;  %v1781_v56 = vadd.f32 %v1780_v10, %v3676_v25 }
 0x514   : > { %v3000_v14 = vpop.eup %2999  ;;  %3015 = vpow2.f32 %v1935_v5  ;;  %v1937_v16 = vmul.f32 1.442695, %v1879_v9  ;;  %v1782_v51 = vpop.f32.mrf.mxu0 }
 0x515   : > { %3017 = vrcp.f32 %v2015_v12  ;;  %v2016_v17 = vadd.f32 1.0, %v3000_v14  ;;  %v1939_v19 = vmul.f32 1.442695, %v1880_v13  ;;  %v1881_v20 = vsub.f32 0.0, %v1781_v56 }
 0x516   : > { %v3002_v21 = vpop.eup %3001  ;;  %3019 = vpow2.f32 %v1937_v16  ;;  %v1783_v22 = vadd.f32 %v1782_v51, %v3678_v54  ;;  %v1784_v58 = vpop.f32.mrf.mxu0 }
 0x517   : > { %3021 = vrcp.f32 %v2016_v17  ;;  %v2017_v40 = vadd.f32 1.0, %v3002_v21  ;;  %v1941_v60 = vmul.f32 1.442695, %v1881_v20  ;;  %v1785_v55 = vadd.f32 %v1784_v58, %v3676_v25 }
 0x518   : > { %v3004_v0 = vpop.eup %3003  ;;  %3023 = vpow2.f32 %v1939_v19  ;;  %v1882_v27 = vsub.f32 0.0, %v1783_v22  ;;  %v1786_v28 = vpop.f32.mrf.mxu0 }
 0x519   : > { %3025 = vrcp.f32 %v2017_v40  ;;  %v2018_v29 = vadd.f32 1.0, %v3004_v0  ;;  %v1883_v50 = vsub.f32 0.0, %v1785_v55  ;;  %v1787_v32 = vadd.f32 %v1786_v28, %v3678_v54 }
 0x51a   : > { %v3006_v33 = vpop.eup %3005  ;;  %3027 = vpow2.f32 %v1941_v60  ;;  %v1943_v35 = vmul.f32 1.442695, %v1882_v27  ;;  %v1790_v34 = vpop.f32.mrf.mxu0 }
 0x51b   : > { %3029 = vrcp.f32 %v2018_v29  ;;  %v2019_v36 = vadd.f32 1.0, %v3006_v33  ;;  %v1945_v3 = vmul.f32 1.442695, %v1883_v50  ;;  %v1884_v8 = vsub.f32 0.0, %v1787_v32 }
 0x51c   : > { %v3008_v11 = vpop.eup %3007  ;;  %3031 = vpow2.f32 %v1943_v35  ;;  %v1791_v15 = vadd.f32 %v1790_v34, %v3676_v25  ;;  %v1792_v37 = vpop.f32.mrf.mxu0 }
 0x51d   : > { %3033 = vrcp.f32 %v2019_v36  ;;  %v2020_v38 = vadd.f32 1.0, %v3008_v11  ;;  %v1947_v39 = vmul.f32 1.442695, %v1884_v8  ;;  %v1793_v41 = vadd.f32 %v1792_v37, %v3678_v54 }
 0x51e   : > { %v3010_v42 = vpop.eup %3009  ;;  %3035 = vpow2.f32 %v1945_v3  ;;  %v1885_v53 = vsub.f32 0.0, %v1791_v15  ;;  %v1794_v18 = vpop.f32.mrf.mxu0 }
 0x51f   : > { %v3012_v23 = vpop.eup %3011  ;;  %3037 = vrcp.f32 %v2020_v38  ;;  %v1886_v24 = vsub.f32 0.0, %v1793_v41  ;;  %v1795_v26 = vadd.f32 %v1794_v18, %v3676_v25 }
 0x520   : > { %v3014_v31 = vpop.eup %3013  ;;  %v2021_v44 = vadd.f32 1.0, %v3012_v23  ;;  %3039 = vpow2.f32 %v1947_v39  ;;  %v1949_v45 = vmul.f32 1.442695, %v1885_v53  ;;  %v1796_v46 = vpop.f32.mrf.mxu0 }
 0x521   : > { %v3016_v47 = vpop.eup %3015  ;;  %v2508_v30 = vpack.c.bf16 %v3014_v31, %v3010_v42  ;;  %v1951_v49 = vmul.f32 1.442695, %v1886_v24  ;;  %v1887_v57 = vsub.f32 0.0, %v1795_v26  ;;  %v1797_v59 = vadd.f32 %v1796_v46, %v3678_v54 }
 0x522   : > { %v3018_v61 = vpop.eup %3017  ;;  %3041 = vrcp.f32 %v2021_v44  ;;  %v2022_v43 = vadd.f32 1.0, %v3016_v47  ;;  %v1800_v48 = vpop.f32.mrf.mxu0 }
 0x523   : > { %v3020_v62 = vpop.eup %3019  ;;  %2253 = vst [vmem:[%s3704_s17] sm:$0xff] %v2508_v30  ;;  %3043 = vpow2.f32 %v1949_v45  ;;  %v1953_v63 = vmul.f32 1.442695, %v1887_v57  ;;  %v1888_v2 = vsub.f32 0.0, %v1797_v59  ;;  %v1801_v52 = vadd.f32 %v1800_v48, %v3676_v25 }
 0x524   : > { %v3022_v1 = vpop.eup %3021  ;;  %3045 = vrcp.f32 %v2022_v43  ;;  %v2023_v4 = vadd.f32 1.0, %v3020_v62  ;;  %v1802_v5 = vpop.f32.mrf.mxu0 }
 0x525   : > { %v3024_v6 = vpop.eup %3023  ;;  %v2509_v7 = vpack.c.bf16 %v3022_v1, %v3018_v61  ;;  %3047 = vpow2.f32 %v1951_v49  ;;  %v1955_v9 = vmul.f32 1.442695, %v1888_v2  ;;  %v1889_v10 = vsub.f32 0.0, %v1801_v52 }
 0x526   : > { %v3026_v12 = vpop.eup %3025  ;;  %3049 = vrcp.f32 %v2023_v4  ;;  %v2024_v13 = vadd.f32 1.0, %v3024_v6  ;;  %v1803_v56 = vadd.f32 %v1802_v5, %v3678_v54  ;;  %v1804_v14 = vpop.f32.mrf.mxu0 }
 0x527   : > { %v3028_v16 = vpop.eup %3027  ;;  %2254 = vst [vmem:[%s3704_s17 + $0x8] sm:$0xff] %v2509_v7  ;;  %3051 = vpow2.f32 %v1953_v63  ;;  %v1957_v51 = vmul.f32 1.442695, %v1889_v10  ;;  %v1805_v17 = vadd.f32 %v1804_v14, %v3676_v25 }
 0x528   : > { %v3030_v19 = vpop.eup %3029  ;;  %3053 = vrcp.f32 %v2024_v13  ;;  %v2025_v20 = vadd.f32 1.0, %v3028_v16  ;;  %v1890_v21 = vsub.f32 0.0, %v1803_v56  ;;  %v1806_v22 = vpop.f32.mrf.mxu0 }
 0x529   : > { %v3032_v58 = vpop.eup %3031  ;;  %v2510_v40 = vpack.c.bf16 %v3030_v19, %v3026_v12  ;;  %3055 = vpow2.f32 %v1955_v9  ;;  %v1891_v60 = vsub.f32 0.0, %v1805_v17  ;;  %v1807_v55 = vadd.f32 %v1806_v22, %v3678_v54 }
 0x52a   : > { %v3034_v0 = vpop.eup %3033  ;;  %3057 = vrcp.f32 %v2025_v20  ;;  %v2026_v27 = vadd.f32 1.0, %v3032_v58  ;;  %v1959_v28 = vmul.f32 1.442695, %v1890_v21  ;;  %v1810_v29 = vpop.f32.mrf.mxu0 }
 0x52b   : > { %v3036_v50 = vpop.eup %3035  ;;  %2255 = vst [vmem:[%s3704_s17 + $0x10] sm:$0xff] %v2510_v40  ;;  %3059 = vpow2.f32 %v1957_v51  ;;  %v1961_v32 = vmul.f32 1.442695, %v1891_v60  ;;  %v1892_v33 = vsub.f32 0.0, %v1807_v55  ;;  %v1811_v35 = vadd.f32 %v1810_v29, %v3676_v25 }
 0x52c   : > { %v3038_v34 = vpop.eup %3037  ;;  %3061 = vrcp.f32 %v2026_v27  ;;  %v2027_v36 = vadd.f32 1.0, %v3036_v50  ;;  %v1812_v3 = vpop.f32.mrf.mxu0 }
 0x52d   : > { %v3040_v8 = vpop.eup %3039  ;;  %v2511_v11 = vpack.c.bf16 %v3038_v34, %v3034_v0  ;;  %3063 = vpow2.f32 %v1959_v28  ;;  %v1963_v15 = vmul.f32 1.442695, %v1892_v33  ;;  %v1893_v37 = vsub.f32 0.0, %v1811_v35 }
 0x52e   : > { %3065 = vrcp.f32 %v2027_v36  ;;  %v2028_v38 = vadd.f32 1.0, %v3040_v8  ;;  %v1813_v39 = vadd.f32 %v1812_v3, %v3678_v54  ;;  %v1814_v41 = vpop.f32.mrf.mxu0 }
 0x52f   : > { %v3042_v42 = vpop.eup %3041  ;;  %2256 = vst [vmem:[%s3704_s17 + $0x18] sm:$0xff] %v2511_v11  ;;  %3067 = vpow2.f32 %v1961_v32  ;;  %v1965_v53 = vmul.f32 1.442695, %v1893_v37  ;;  %v1815_v18 = vadd.f32 %v1814_v41, %v3676_v25 }
 0x530   : > { %v3044_v23 = vpop.eup %3043  ;;  %3069 = vrcp.f32 %v2028_v38  ;;  %v1894_v24 = vsub.f32 0.0, %v1813_v39  ;;  %v1816_v26 = vpop.f32.mrf.mxu0 }
 0x531   : > { %v3046_v31 = vpop.eup %3045  ;;  %v2029_v44 = vadd.f32 1.0, %v3044_v23  ;;  %3071 = vpow2.f32 %v1963_v15  ;;  %v1895_v45 = vsub.f32 0.0, %v1815_v18  ;;  %v1817_v46 = vadd.f32 %v1816_v26, %v3678_v54 }
 0x532   : > { %v3048_v47 = vpop.eup %3047  ;;  %v2512_v30 = vpack.c.bf16 %v3046_v31, %v3042_v42  ;;  %3073 = vpow2.f32 %v1965_v53  ;;  %v1967_v49 = vmul.f32 1.442695, %v1894_v24  ;;  %v1820_v57 = vpop.f32.mrf.mxu0 }
 0x533   : > { %v3050_v59 = vpop.eup %3049  ;;  %3075 = vrcp.f32 %v2029_v44  ;;  %v2030_v61 = vadd.f32 1.0, %v3048_v47  ;;  %v1969_v43 = vmul.f32 1.442695, %v1895_v45  ;;  %v1896_v48 = vsub.f32 0.0, %v1817_v46 }
 0x534   : > { %v3052_v62 = vpop.eup %3051  ;;  %2257 = vst [vmem:[%s3704_s17 + $0x20] sm:$0xff] %v2512_v30  ;;  %3077 = vpow2.f32 %v1967_v49  ;;  %v1821_v63 = vadd.f32 %v1820_v57, %v3676_v25  ;;  %v1822_v2 = vpop.f32.mrf.mxu0 }
 0x535   : > { %v3054_v52 = vpop.eup %3053  ;;  %3079 = vrcp.f32 %v2030_v61  ;;  %v2031_v1 = vadd.f32 1.0, %v3052_v62  ;;  %v1971_v4 = vmul.f32 1.442695, %v1896_v48  ;;  %v1823_v5 = vadd.f32 %v1822_v2, %v3678_v54 }
 0x536   : > { %v3056_v6 = vpop.eup %3055  ;;  %v2513_v7 = vpack.c.bf16 %v3054_v52, %v3050_v59  ;;  %3081 = vpow2.f32 %v1969_v43  ;;  %v1897_v9 = vsub.f32 0.0, %v1821_v63  ;;  %v1824_v10 = vpop.f32.mrf.mxu0 }
 0x537   : > { %v3058_v12 = vpop.eup %3057  ;;  %3083 = vrcp.f32 %v2031_v1  ;;  %v2032_v13 = vadd.f32 1.0, %v3056_v6  ;;  %v1898_v56 = vsub.f32 0.0, %v1823_v5  ;;  %v1825_v14 = vadd.f32 %v1824_v10, %v3676_v25 }
 0x538   : > { %v3060_v16 = vpop.eup %3059  ;;  %2258 = vst [vmem:[%s3704_s17 + $0x28] sm:$0xff] %v2513_v7  ;;  %3085 = vpow2.f32 %v1971_v4  ;;  %v1973_v51 = vmul.f32 1.442695, %v1897_v9  ;;  %v1826_v17 = vpop.f32.mrf.mxu0 }
 0x539   : > { %v3062_v19 = vpop.eup %3061  ;;  %3087 = vrcp.f32 %v2032_v13  ;;  %v2033_v20 = vadd.f32 1.0, %v3060_v16  ;;  %v1975_v21 = vmul.f32 1.442695, %v1898_v56  ;;  %v1899_v22 = vsub.f32 0.0, %v1825_v14 }
 0x53a   : > { %v3064_v58 = vpop.eup %3063  ;;  %v2514_v40 = vpack.c.bf16 %v3062_v19, %v3058_v12  ;;  %3089 = vpow2.f32 %v1973_v51  ;;  %v1827_v60 = vadd.f32 %v1826_v17, %v3678_v54  ;;  %v1830_v55 = vpop.f32.mrf.mxu0 }
 0x53b   : > { %v3066_v0 = vpop.eup %3065  ;;  %3091 = vrcp.f32 %v2033_v20  ;;  %v2034_v27 = vadd.f32 1.0, %v3064_v58  ;;  %v1977_v28 = vmul.f32 1.442695, %v1899_v22  ;;  %v1831_v29 = vadd.f32 %v1830_v55, %v3676_v25 }
 0x53c   : > { %v3068_v50 = vpop.eup %3067  ;;  %2259 = vst [vmem:[%s3704_s17 + $0x30] sm:$0xff] %v2514_v40  ;;  %3093 = vpow2.f32 %v1975_v21  ;;  %v1900_v32 = vsub.f32 0.0, %v1827_v60  ;;  %v1832_v33 = vpop.f32.mrf.mxu0 }
 0x53d   : > { %v3070_v35 = vpop.eup %3069  ;;  %3095 = vrcp.f32 %v2034_v27  ;;  %v2035_v34 = vadd.f32 1.0, %v3068_v50  ;;  %v1901_v36 = vsub.f32 0.0, %v1831_v29  ;;  %v1833_v3 = vadd.f32 %v1832_v33, %v3678_v54 }
 0x53e   : > { %v3072_v8 = vpop.eup %3071  ;;  %v2515_v11 = vpack.c.bf16 %v3070_v35, %v3066_v0  ;;  %3097 = vpow2.f32 %v1977_v28  ;;  %v1979_v15 = vmul.f32 1.442695, %v1900_v32  ;;  %v1834_v37 = vpop.f32.mrf.mxu0 }
 0x53f   : > { %v3074_v38 = vpop.eup %3073  ;;  %3099 = vrcp.f32 %v2035_v34  ;;  %v2036_v39 = vadd.f32 1.0, %v3072_v8  ;;  %v1981_v41 = vmul.f32 1.442695, %v1901_v36  ;;  %v1902_v42 = vsub.f32 0.0, %v1833_v3 }
 0x540   : > { %v3076_v53 = vpop.eup %3075  ;;  %2260 = vst [vmem:[%s3704_s17 + $0x38] sm:$0xff] %v2515_v11  ;;  %v2037_v18 = vadd.f32 1.0, %v3074_v38  ;;  %3101 = vpow2.f32 %v1979_v15  ;;  %v1835_v23 = vadd.f32 %v1834_v37, %v3676_v25  ;;  %v1836_v24 = vpop.f32.mrf.mxu0 }
 0x541   : > { %v3078_v26 = vpop.eup %3077  ;;  %3103 = vrcp.f32 %v2036_v39  ;;  %v1983_v31 = vmul.f32 1.442695, %v1902_v42  ;;  %v1837_v44 = vadd.f32 %v1836_v24, %v3678_v54 }
 0x542   : > { %v3080_v45 = vpop.eup %3079  ;;  %3105 = vrcp.f32 %v2037_v18  ;;  %v2038_v46 = vadd.f32 1.0, %v3078_v26  ;;  %v1903_v47 = vsub.f32 0.0, %v1835_v23  ;;  %v1840_v30 = vpop.f32.mrf.mxu0 }
 0x543   : > { %v3082_v49 = vpop.eup %3081  ;;  %v2516_v57 = vpack.c.bf16 %v3080_v45, %v3076_v53  ;;  %3107 = vpow2.f32 %v1981_v41  ;;  %v1904_v59 = vsub.f32 0.0, %v1837_v44  ;;  %v1841_v61 = vadd.f32 %v1840_v30, %v3676_v25 }
 0x544   : > { %v3084_v43 = vpop.eup %3083  ;;  %3109 = vrcp.f32 %v2038_v46  ;;  %v2039_v48 = vadd.f32 1.0, %v3082_v49  ;;  %v1985_v62 = vmul.f32 1.442695, %v1903_v47  ;;  %v1842_v63 = vpop.f32.mrf.mxu0 }
 0x545   : > { %v3086_v2 = vpop.eup %3085  ;;  %2261 = vst [vmem:[%s3704_s17 + $0x40] sm:$0xff] %v2516_v57  ;;  %3111 = vpow2.f32 %v1983_v31  ;;  %v1987_v52 = vmul.f32 1.442695, %v1904_v59  ;;  %v1905_v1 = vsub.f32 0.0, %v1841_v61  ;;  %v1843_v4 = vadd.f32 %v1842_v63, %v3678_v54 }
 0x546   : > { %v3088_v5 = vpop.eup %3087  ;;  %3113 = vrcp.f32 %v2039_v48  ;;  %v2040_v6 = vadd.f32 1.0, %v3086_v2  ;;  %v1844_v7 = vpop.f32.mrf.mxu0 }
 0x547   : > { %v3090_v9 = vpop.eup %3089  ;;  %v2517_v10 = vpack.c.bf16 %v3088_v5, %v3084_v43  ;;  %3115 = vpow2.f32 %v1985_v62  ;;  %v1989_v12 = vmul.f32 1.442695, %v1905_v1  ;;  %v1906_v13 = vsub.f32 0.0, %v1843_v4 }
 0x548   : > { %v3092_v56 = vpop.eup %3091  ;;  %3117 = vrcp.f32 %v2040_v6  ;;  %v2041_v14 = vadd.f32 1.0, %v3090_v9  ;;  %v1845_v16 = vadd.f32 %v1844_v7, %v3676_v25  ;;  %v1846_v51 = vpop.f32.mrf.mxu0 }
 0x549   : > { %v3094_v17 = vpop.eup %3093  ;;  %2262 = vst [vmem:[%s3704_s17 + $0x48] sm:$0xff] %v2517_v10  ;;  %3119 = vpow2.f32 %v1987_v52  ;;  %v1991_v19 = vmul.f32 1.442695, %v1906_v13  ;;  %v1847_v20 = vadd.f32 %v1846_v51, %v3678_v54 }
 0x54a   : > { %v3096_v21 = vpop.eup %3095  ;;  %3121 = vrcp.f32 %v2041_v14  ;;  %v2042_v22 = vadd.f32 1.0, %v3094_v17  ;;  %v1907_v58 = vsub.f32 0.0, %v1845_v16  ;;  %v1850_v40 = vpop.f32.mrf.mxu0 }
 0x54b   : > { %v3098_v60 = vpop.eup %3097  ;;  %v2518_v55 = vpack.c.bf16 %v3096_v21, %v3092_v56  ;;  %3123 = vpow2.f32 %v1989_v12  ;;  %v1908_v0 = vsub.f32 0.0, %v1847_v20  ;;  %v1851_v27 = vadd.f32 %v1850_v40, %v3676_v25 }
 0x54c   : > { %v3100_v28 = vpop.eup %3099  ;;  %3125 = vrcp.f32 %v2042_v22  ;;  %v2043_v29 = vadd.f32 1.0, %v3098_v60  ;;  %v1993_v50 = vmul.f32 1.442695, %v1907_v58  ;;  %v1852_v32 = vpop.f32.mrf.mxu0 }
 0x54d   : > { %v3102_v33 = vpop.eup %3101  ;;  %2263 = vst [vmem:[%s3704_s17 + $0x50] sm:$0xff] %v2518_v55  ;;  %3127 = vpow2.f32 %v1991_v19  ;;  %v1995_v35 = vmul.f32 1.442695, %v1908_v0  ;;  %v1909_v34 = vsub.f32 0.0, %v1851_v27  ;;  %v1853_v36 = vadd.f32 %v1852_v32, %v3678_v54 }
 0x54e   : > { %v3104_v3 = vpop.eup %3103  ;;  %3129 = vrcp.f32 %v2043_v29  ;;  %v2044_v8 = vadd.f32 1.0, %v3102_v33  ;;  %v1854_v11 = vpop.f32.mrf.mxu0 }
 0x54f   : > { %v3106_v15 = vpop.eup %3105  ;;  %v2519_v37 = vpack.c.bf16 %v3104_v3, %v3100_v28  ;;  %3131 = vpow2.f32 %v1993_v50  ;;  %v1997_v38 = vmul.f32 1.442695, %v1909_v34  ;;  %v1910_v39 = vsub.f32 0.0, %v1853_v36 }
 0x550   : > { %v3108_v41 = vpop.eup %3107  ;;  %3133 = vrcp.f32 %v2044_v8  ;;  %v1855_v42 = vadd.f32 %v1854_v11, %v3676_v25  ;;  %v1856_v53 = vpop.f32.mrf.mxu0 }
 0x551   : > { %v3110_v18 = vpop.eup %3109  ;;  %2264 = vst [vmem:[%s3704_s17 + $0x58] sm:$0xff] %v2519_v37  ;;  %v2045_v23 = vadd.f32 1.0, %v3108_v41  ;;  %3135 = vpow2.f32 %v1995_v35  ;;  %v1999_v24 = vmul.f32 1.442695, %v1910_v39  ;;  %v1857_v26 = vadd.f32 %v1856_v53, %v3678_v54 }
 0x552   : > { %v3112_v31 = vpop.eup %3111  ;;  %v2520_v44 = vpack.c.bf16 %v3110_v18, %v3106_v15  ;;  %3137 = vpow2.f32 %v1997_v38  ;;  %v1911_v45 = vsub.f32 0.0, %v1855_v42  ;;  %v1860_v46 = vpop.f32.mrf.mxu0 }
 0x553   : > { %v3114_v47 = vpop.eup %3113  ;;  %3139 = vrcp.f32 %v2045_v23  ;;  %v2046_v30 = vadd.f32 1.0, %v3112_v31  ;;  %v1912_v49 = vsub.f32 0.0, %v1857_v26  ;;  %v1861_v57 = vadd.f32 %v1860_v46, %v3676_v25 }
 0x554   : > { %v3116_v59 = vpop.eup %3115  ;;  %2265 = vst [vmem:[%s3704_s17 + $0x60] sm:$0xff] %v2520_v44  ;;  %3141 = vpow2.f32 %v1999_v24  ;;  %v2001_v61 = vmul.f32 1.442695, %v1911_v45  ;;  %v1862_v43 = vpop.f32.mrf.mxu0 }
 0x555   : > { %v3118_v48 = vpop.eup %3117  ;;  %3143 = vrcp.f32 %v2046_v30  ;;  %v2047_v62 = vadd.f32 1.0, %v3116_v59  ;;  %v2003_v63 = vmul.f32 1.442695, %v1912_v49  ;;  %v1913_v2 = vsub.f32 0.0, %v1861_v57 }
 0x556   : > { %v3120_v52 = vpop.eup %3119  ;;  %v2521_v1 = vpack.c.bf16 %v3118_v48, %v3114_v47  ;;  %3145 = vpow2.f32 %v2001_v61  ;;  %v1863_v4 = vadd.f32 %v1862_v43, %v3678_v54  ;;  %v1864_v5 = vpop.f32.mrf.mxu0 }
 0x557   : > { %v3122_v6 = vpop.eup %3121  ;;  %3147 = vrcp.f32 %v2047_v62  ;;  %v2048_v7 = vadd.f32 1.0, %v3120_v52  ;;  %v2005_v9 = vmul.f32 1.442695, %v1913_v2  ;;  %v1865_v10 = vadd.f32 %v1864_v5, %v3676_v25 }
 0x558   : > { %v3124_v12 = vpop.eup %3123  ;;  %2266 = vst [vmem:[%s3704_s17 + $0x68] sm:$0xff] %v2521_v1  ;;  %3149 = vpow2.f32 %v2003_v63  ;;  %v1914_v13 = vsub.f32 0.0, %v1863_v4  ;;  %v1866_v56 = vpop.f32.mrf.mxu0 }
 0x559   : > { %v3126_v14 = vpop.eup %3125  ;;  %3151 = vrcp.f32 %v2048_v7  ;;  %v2049_v16 = vadd.f32 1.0, %v3124_v12  ;;  %v1915_v51 = vsub.f32 0.0, %v1865_v10  ;;  %v1867_v17 = vadd.f32 %v1866_v56, %v3678_v54 }
 0x55a   : > { %v3128_v19 = vpop.eup %3127  ;;  %v2522_v20 = vpack.c.bf16 %v3126_v14, %v3122_v6  ;;  %3153 = vpow2.f32 %v2005_v9  ;;  %v2007_v21 = vmul.f32 1.442695, %v1914_v13 }
 0x55b   : > { %v3130_v22 = vpop.eup %3129  ;;  %3155 = vrcp.f32 %v2049_v16  ;;  %v2050_v58 = vadd.f32 1.0, %v3128_v19  ;;  %v2009_v25 = vmul.f32 1.442695, %v1915_v51  ;;  %v1916_v40 = vsub.f32 0.0, %v1867_v17 }
 0x55c   : > { %v3132_v60 = vpop.eup %3131  ;;  %2267 = vst [vmem:[%s3704_s17 + $0x70] sm:$0xff] %v2522_v20  ;;  %3157 = vpow2.f32 %v2007_v21 }
 0x55d   : > { %v3134_v55 = vpop.eup %3133  ;;  %3159 = vrcp.f32 %v2050_v58  ;;  %v2051_v0 = vadd.f32 1.0, %v3132_v60  ;;  %v2011_v27 = vmul.f32 1.442695, %v1916_v40 }
 0x55e   : > { %v3136_v28 = vpop.eup %3135  ;;  %v2523_v29 = vpack.c.bf16 %v3134_v55, %v3130_v22  ;;  %3161 = vpow2.f32 %v2009_v25 }
 0x55f   : > { %v3138_v54 = vpop.eup %3137  ;;  %3163 = vrcp.f32 %v2051_v0  ;;  %v2052_v50 = vadd.f32 1.0, %v3136_v28 }
 0x560   : > { %v3140_v32 = vpop.eup %3139  ;;  %2268 = vst [vmem:[%s3704_s17 + $0x78] sm:$0xff] %v2523_v29  ;;  %v2053_v33 = vadd.f32 1.0, %v3138_v54  ;;  %3165 = vpow2.f32 %v2011_v27 }
 0x561   : > { %v3142_v35 = vpop.eup %3141  ;;  %3167 = vrcp.f32 %v2052_v50 }
 0x562   : > { %v3144_v34 = vpop.eup %3143  ;;  %v2054_v36 = vadd.f32 1.0, %v3142_v35  ;;  %3169 = vrcp.f32 %v2053_v33 }
 0x563   : > { %v3146_v3 = vpop.eup %3145  ;;  %v2524_v8 = vpack.c.bf16 %v3144_v34, %v3140_v32 }
 0x564   : > { %v3148_v11 = vpop.eup %3147  ;;  %3171 = vrcp.f32 %v2054_v36  ;;  %v2055_v15 = vadd.f32 1.0, %v3146_v3 }
 0x565   : > { %v3150_v37 = vpop.eup %3149  ;;  %2269 = vst [vmem:[%s3704_s17 + $0x80] sm:$0xff] %v2524_v8 }
 0x566   : > { %v3152_v38 = vpop.eup %3151  ;;  %v2056_v39 = vadd.f32 1.0, %v3150_v37  ;;  %3173 = vrcp.f32 %v2055_v15 }
 0x567   : > { %v3154_v41 = vpop.eup %3153  ;;  %v2525_v42 = vpack.c.bf16 %v3152_v38, %v3148_v11 }
 0x568   : > { %v3156_v53 = vpop.eup %3155  ;;  %3175 = vrcp.f32 %v2056_v39  ;;  %v2057_v18 = vadd.f32 1.0, %v3154_v41 }
 0x569   : > { %v3158_v23 = vpop.eup %3157  ;;  %2270 = vst [vmem:[%s3704_s17 + $0x88] sm:$0xff] %v2525_v42 }
 0x56a   : > { %v3160_v24 = vpop.eup %3159  ;;  %v2058_v26 = vadd.f32 1.0, %v3158_v23  ;;  %3177 = vrcp.f32 %v2057_v18 }
 0x56b   : > { %v3162_v31 = vpop.eup %3161  ;;  %v2526_v44 = vpack.c.bf16 %v3160_v24, %v3156_v53 }
 0x56c   : > { %v3164_v45 = vpop.eup %3163  ;;  %3179 = vrcp.f32 %v2058_v26  ;;  %v2059_v46 = vadd.f32 1.0, %v3162_v31 }
 0x56d   : > { %v3166_v47 = vpop.eup %3165  ;;  %2271 = vst [vmem:[%s3704_s17 + $0x90] sm:$0xff] %v2526_v44 }
 0x56e   : > { %v3168_v30 = vpop.eup %3167  ;;  %v2060_v49 = vadd.f32 1.0, %v3166_v47  ;;  %3181 = vrcp.f32 %v2059_v46 }
 0x56f   : > { %v2527_v57 = vpack.c.bf16 %v3168_v30, %v3164_v45  ;;  %v3170_v59 = vpop.eup %3169 }
 0x570   : > { %3183 = vrcp.f32 %v2060_v49 }
 0x571   : > { %v3172_v61 = vpop.eup %3171  ;;  %2272 = vst [vmem:[%s3704_s17 + $0x98] sm:$0xff] %v2527_v57 }
 0x572   : > { %v2528_v43 = vpack.c.bf16 %v3172_v61, %v3170_v59 }
 0x573   : > { %v3174_v48 = vpop.eup %3173 }
 0x574   : > { %2273 = vst [vmem:[%s3704_s17 + $0xa0] sm:$0xff] %v2528_v43 }
 0x575   : > { %v3176_v62 = vpop.eup %3175 }
 0x576   : > { %v2529_v63 = vpack.c.bf16 %v3176_v62, %v3174_v48 }
 0x577   : > { %v3178_v2 = vpop.eup %3177 }
 0x578   : > { %2274 = vst [vmem:[%s3704_s17 + $0xa8] sm:$0xff] %v2529_v63 }
 0x579   : > { %v3180_v52 = vpop.eup %3179 }
 0x57a   : > { %v2530_v1 = vpack.c.bf16 %v3180_v52, %v3178_v2 }
 0x57b   : > { %v3182_v4 = vpop.eup %3181 }
 0x57c   : > { %2275 = vst [vmem:[%s3704_s17 + $0xb0] sm:$0xff] %v2530_v1 }
 0x57d   : > { %v3184_v5 = vpop.eup %3183 }
 0x57e   : > { %v2531_v6 = vpack.c.bf16 %v3184_v5, %v3182_v4 }
 0x580   : > { %2276 = vst [vmem:[%s3704_s17 + $0xb8] sm:$0xff] %v2531_v6 }
 0x581 PF: > { %s15_s18 = sadd.s32 1, %s3192_s18  }
 0x582   : > { %p12_p4 = scmp.ge.s32.totalorder %s15_s18, 4  }
 0x584   :  { %14 = sbr.rel (!%p12_p4) target bundleno = 1 (0x1), region = 73 }

</bundles_post_ra>
